<compile_context>
chip_gen: v6e
topology: v6e:2x2x1
jax: 0.10.0
libtpu: 0.0.40
codegen_flags: <defaults>
</compile_context>

<pallas_src>
import math
from functools import partial

import jax
import jax.numpy as jnp
from jax.experimental import pallas as pl
from jax.experimental.pallas import tpu as pltpu


# ----------------------------------------------------------------------------
# In-kernel building blocks (all matmuls accumulate in f32)
# ----------------------------------------------------------------------------
def _dequant(wq):
    # int8 -> f32 -> bf16 on the VPU (free filler while the kernel is DMA-bound).
    # Never feeds int8 into the MXU, so this is portable to v5e/v6e/v7x alike.
    return wq.astype(jnp.float32).astype(jnp.bfloat16)


def _encoder_block(x_ref, w1q_ref, w1s_ref, b1_ref, w2q_ref, w2s_ref, b2lat_ref):
    # x stored in HBM as f32; cast to bf16 in-kernel (saves a standalone XLA cast).
    x = x_ref[...].astype(jnp.bfloat16)
    h = jnp.dot(x, _dequant(w1q_ref[...]), preferred_element_type=jnp.float32)
    # TODO(synk): the ir_se encoder uses PReLU; approximated by ReLU here.
    h = jnp.maximum(h * w1s_ref[...] + b1_ref[...], 0.0)
    c = jnp.dot(h.astype(jnp.bfloat16), _dequant(w2q_ref[...]),
                preferred_element_type=jnp.float32)
    # b2lat = b2 + latent_avg (start_from_latent_avg, learn_in_w=False), pre-folded.
    return c * w2s_ref[...] + b2lat_ref[...]


def _decoder_block(codes, wdq_ref, wds_ref, bd_ref):
    y = jnp.dot(codes.astype(jnp.bfloat16), _dequant(wdq_ref[...]),
                preferred_element_type=jnp.float32)
    return jnp.tanh(y * wds_ref[...] + bd_ref[...])


def _decoder_pool_block(codes, wdpq_ref, wdps_ref, bdp_ref):
    # wdpq: [n_win, code_dim, q] int8 (decoder columns permuted per pool window).
    # Adaptive 2x2 avg pool == mean over windows of tanh(codes @ W_k * s_k + b_k).
    # The per-window terms are independent; tree-add so MXU/EUP/VPU can overlap.
    n_win = wdpq_ref.shape[0]
    cb = codes.astype(jnp.bfloat16)
    terms = [
        jnp.tanh(jnp.dot(cb, _dequant(wdpq_ref[k]),
                         preferred_element_type=jnp.float32)
                 * wdps_ref[k] + bdp_ref[k])
        for k in range(n_win)
    ]
    while len(terms) > 1:
        nxt = [terms[i] + terms[i + 1] for i in range(0, len(terms) - 1, 2)]
        if len(terms) % 2:
            nxt.append(terms[-1])
        terms = nxt
    return terms[0] * (1.0 / n_win)


# ----------------------------------------------------------------------------
# Pallas kernels
# ----------------------------------------------------------------------------
def _make_fused_kernel(edit, pool):
    def kernel(x_ref, w1q, w1s, b1, w2q, w2s, b2lat, *rest):
        if edit:
            mask_ref, inject_ref = rest[0], rest[1]
            rest = rest[2:]
        dq, ds, db, codes_ref, out_ref = rest
        codes = _encoder_block(x_ref, w1q, w1s, b1, w2q, w2s, b2lat)
        if edit:
            m = mask_ref[...]  # per-style mask * blend, expanded over code_dim
            codes = codes * (1.0 - m) + m * inject_ref[...]
        codes_ref[...] = codes
        if pool:
            out_ref[...] = _decoder_pool_block(codes, dq, ds, db)
        else:
            out_ref[...] = _decoder_block(codes, dq, ds, db)

    return kernel


def _make_decoder_kernel(pool):
    def kernel(codes_ref, dq, ds, db, out_ref):
        codes = codes_ref[...]
        if pool:
            out_ref[...] = _decoder_pool_block(codes, dq, ds, db)
        else:
            out_ref[...] = _decoder_block(codes, dq, ds, db)

    return kernel


# ----------------------------------------------------------------------------
# pallas_call plumbing: 1-D batch-row grid; weights use constant-index BlockSpecs
# so they stay VMEM-resident across grid steps.
# ----------------------------------------------------------------------------
def _row_spec(tm, shape):
    nd = len(shape)
    return pl.BlockSpec((tm,) + tuple(shape[1:]),
                        lambda i, _n=nd: (i,) + (0,) * (_n - 1))


def _const_spec(shape):
    nd = len(shape)
    return pl.BlockSpec(tuple(shape), lambda i, _n=nd: (0,) * _n)


_COMPILER_PARAMS = pltpu.CompilerParams(
    # batch-grid axis is embarrassingly parallel -> both TensorCores on v7x,
    # no-op on v5e/v6e.
    dimension_semantics=("parallel",),
    # headroom for the in-kernel dequant intermediates (v5e default scope is 16 MiB);
    # 32 MiB is within every generation's physical VMEM.
    vmem_limit_bytes=32 * 1024 * 1024,
)


def _cost(args, out_shapes, flops, transcendentals):
    bytes_accessed = sum(int(a.size) * a.dtype.itemsize for a in args)
    bytes_accessed += sum(4 * int(math.prod(s)) for s in out_shapes)
    return pl.CostEstimate(flops=int(flops), transcendentals=int(transcendentals),
                           bytes_accessed=int(bytes_accessed))


def _call(kernel, args, row_flags, out_cols, Bp, tm, cost):
    in_specs = [(_row_spec(tm, a.shape) if f else _const_spec(a.shape))
                for a, f in zip(args, row_flags)]
    out_shape = tuple(jax.ShapeDtypeStruct((Bp, c), jnp.float32) for c in out_cols)
    out_specs = tuple(_row_spec(tm, (Bp, c)) for c in out_cols)
    return pl.pallas_call(
        kernel,
        grid=(Bp // tm,),
        in_specs=in_specs,
        out_specs=out_specs,
        out_shape=out_shape,
        compiler_params=_COMPILER_PARAMS,
        cost_estimate=cost,
    )(*args)


def _pad_rows(a, mult):
    pad = (-a.shape[0]) % mult
    if pad == 0:
        return a
    return jnp.pad(a, ((0, pad),) + ((0, 0),) * (a.ndim - 1))


# ----------------------------------------------------------------------------
# jitted wrappers (glue fuses with the custom call; no tiny standalone XLA ops)
# ----------------------------------------------------------------------------
@partial(jax.jit, static_argnames=("pool", "edit", "tm"))
def _fused_forward_impl(x, mask_row, inject, enc, dec, *, pool, edit, tm):
    B = x.shape[0]
    x2 = _pad_rows(x.reshape(B, -1).astype(jnp.float32), tm)
    Bp = x2.shape[0]

    args = [x2, enc["w1q"], enc["w1s"], enc["b1"],
            enc["w2q"], enc["w2s"], enc["b2lat"]]
    row_flags = [True, False, False, False, False, False, False]
    if edit:
        inj = _pad_rows(inject.reshape(B, -1).astype(jnp.float32), tm)
        args += [mask_row, inj]
        row_flags += [False, True]
    args += [dec["wq"], dec["ws"], dec["b"]]
    row_flags += [False, False, False]

    in_dim = x2.shape[1]
    hidden = enc["b1"].shape[1]
    code_dim = enc["b2lat"].shape[1]
    out_cols = dec["b"].shape[-1]
    out_total = (dec["b"].shape[0] * out_cols) if pool else out_cols  # decoder N
    flops = 2 * Bp * (in_dim * hidden + hidden * code_dim + code_dim * out_total)
    cost = _cost(args, [(Bp, code_dim), (Bp, out_cols)], flops, Bp * out_total)

    codes, out = _call(_make_fused_kernel(edit, pool), args, row_flags,
                       [code_dim, out_cols], Bp, tm, cost)
    return codes[:B], out[:B]


@partial(jax.jit, static_argnames=("pool", "tm"))
def _decode_impl(codes, dec, *, pool, tm):
    B = codes.shape[0]
    c2 = _pad_rows(codes.reshape(B, -1).astype(jnp.float32), tm)
    Bp = c2.shape[0]
    args = [c2, dec["wq"], dec["ws"], dec["b"]]
    row_flags = [True, False, False, False]
    code_dim = c2.shape[1]
    out_cols = dec["b"].shape[-1]
    out_total = (dec["b"].shape[0] * out_cols) if pool else out_cols
    flops = 2 * Bp * code_dim * out_total
    cost = _cost(args, [(Bp, out_cols)], flops, Bp * out_total)
    (img,) = _call(_make_decoder_kernel(pool), args, row_flags,
                   [out_cols], Bp, tm, cost)
    return img[:B]


# ----------------------------------------------------------------------------
# weight quantization (per-output-channel symmetric int8)
# ----------------------------------------------------------------------------
def _quantize_int8(w):
    amax = jnp.max(jnp.abs(w), axis=0, keepdims=True)
    scale = jnp.maximum(amax, 1e-12) / 127.0
    wq = jnp.clip(jnp.round(w / scale), -127.0, 127.0).astype(jnp.int8)
    return wq, scale.astype(jnp.float32)


# ----------------------------------------------------------------------------
# pSp model (synthetic, deterministic weights)
# ----------------------------------------------------------------------------
class PSPPallas:
    def __init__(self, output_size=16, in_channels=3, style_dim=128, hidden=256,
                 pooled_size=8, seed=0, row_tile=16):
        self.output_size = output_size
        self.in_channels = in_channels
        self.style_dim = style_dim
        self.hidden = hidden
        self.pooled_size = pooled_size
        self.row_tile = row_tile  # 16 rows -> full bf16-packed (16,128) tiles
        # opts.n_styles = int(log2(output_size)) * 2 - 2
        self.n_styles = int(math.log(output_size, 2)) * 2 - 2

        self.in_dim = in_channels * output_size * output_size
        self.code_dim = self.n_styles * style_dim
        self.out_dim = self.in_dim

        key = jax.random.PRNGKey(seed)
        k1, k2, k3, k4 = jax.random.split(key, 4)
        s = 0.02
        # float masters (temporaries) ------------------------------------------------
        w1 = s * jax.random.normal(k1, (self.in_dim, hidden), dtype=jnp.float32)
        w2 = s * jax.random.normal(k2, (hidden, self.code_dim), dtype=jnp.float32)
        w_dec = s * jax.random.normal(k4, (self.code_dim, self.out_dim),
                                      dtype=jnp.float32)
        b1 = jnp.zeros((1, hidden), jnp.float32)
        b2 = jnp.zeros((1, self.code_dim), jnp.float32)
        b_dec = jnp.zeros((1, self.out_dim), jnp.float32)

        # latent_avg: [style_dim] repeated n_styles times, folded into encoder bias
        lat = s * jax.random.normal(k3, (style_dim,), dtype=jnp.float32)
        self.latent_avg = jnp.tile(lat, (self.n_styles,)).reshape(self.n_styles,
                                                                  style_dim)

        # int8 + per-output-channel scales -------------------------------------------
        w1q, w1s = _quantize_int8(w1)
        w2q, w2s = _quantize_int8(w2)
        wdq, wds = _quantize_int8(w_dec)
        self.enc = dict(w1q=w1q, w1s=w1s, b1=b1, w2q=w2q, w2s=w2s,
                        b2lat=b2 + self.latent_avg.reshape(1, self.code_dim))
        self.dec = dict(wq=wdq, ws=wds, b=b_dec)

        # --- face_pool: permute decoder columns into (dh, dw, c, ho, wo) order so the
        # adaptive 2x2 average pool becomes a mean over n_win per-window dots.  The
        # SAME quantized values / scales are reused, so pool vs full paths agree.
        stride = output_size // pooled_size
        self.stride = stride
        self.n_win = stride * stride
        self.pool_q = in_channels * pooled_size * pooled_size
        C, H, Ho, Wo = in_channels, output_size, pooled_size, pooled_size
        dh, dw, c, ho, wo = jnp.meshgrid(jnp.arange(stride), jnp.arange(stride),
                                         jnp.arange(C), jnp.arange(Ho),
                                         jnp.arange(Wo), indexing="ij")
        perm = (c * H * H + (ho * stride + dh) * H + (wo * stride + dw)).reshape(-1)
        wdpq = (wdq[:, perm].reshape(self.code_dim, self.n_win, self.pool_q)
                .transpose(1, 0, 2))                       # [n_win, code_dim, q] int8
        wdps = (wds[:, perm].reshape(1, self.n_win, self.pool_q)
                .transpose(1, 0, 2))                       # [n_win, 1, q] f32
        bdp = (b_dec[:, perm].reshape(1, self.n_win, self.pool_q)
               .transpose(1, 0, 2))                        # [n_win, 1, q] f32
        self.dec_pool = dict(wq=wdpq, ws=wdps, b=bdp)

    # ------------------------------------------------ fused encoder(+edit)+decoder
    def encode_decode(self, x, pool=False, latent_mask=None, inject_latent=None,
                      alpha=None):
        B = x.shape[0]
        edit = latent_mask is not None
        mask_row, inject = None, None
        if edit:
            style_mask = jnp.zeros((self.n_styles,), jnp.float32)
            style_mask = style_mask.at[jnp.asarray(latent_mask)].set(1.0)
            blend = 1.0 if (inject_latent is None or alpha is None) else float(alpha)
            mask_row = jnp.broadcast_to(
                (style_mask * blend)[:, None],
                (self.n_styles, self.style_dim)).reshape(1, self.code_dim)
            if inject_latent is None:
                inject = jnp.zeros((B, self.code_dim), jnp.float32)
            else:
                inject = inject_latent.reshape(B, self.code_dim).astype(jnp.float32)
        dec = self.dec_pool if pool else self.dec
        size = self.pooled_size if pool else self.output_size
        codes, out = _fused_forward_impl(x, mask_row, inject, self.enc, dec,
                                         pool=pool, edit=edit, tm=self.row_tile)
        codes = codes.reshape(B, self.n_styles, self.style_dim)
        images = out.reshape(B, self.in_channels, size, size)
        return codes, images

    # ------------------------------------------------------------------ decoder
    def decode(self, codes, pool=False):
        B = codes.shape[0]
        dec = self.dec_pool if pool else self.dec
        size = self.pooled_size if pool else self.output_size
        img = _decode_impl(codes, dec, pool=pool, tm=self.row_tile)
        return img.reshape(B, self.in_channels, size, size)

    # ------------------------------------------------------------------ forward
    def forward(self, x, id_loss_threshold, resize=True, latent_mask=None,
                input_code=False, randomize_noise=True, inject_latent=None,
                return_latents=False, alpha=None):
        pool = not resize  # reference applies face_pool on the `not resize` branch

        if input_code:
            codes = x.astype(jnp.float32)
            if latent_mask is not None:  # rare path: edit in plain JAX
                for i in latent_mask:
                    if inject_latent is not None:
                        if alpha is not None:
                            codes = codes.at[:, i].set(
                                alpha * inject_latent[:, i]
                                + (1 - alpha) * codes[:, i])
                        else:
                            codes = codes.at[:, i].set(inject_latent[:, i])
                    else:
                        codes = codes.at[:, i].set(0.0)
            images = self.decode(codes, pool=pool)
            result_latent = codes
        else:
            # single fused kernel: encoder -> (optional per-style edit) -> decoder
            # (-> face_pool); codes / image never leave VMEM between stages.
            codes, images = self.encode_decode(
                x, pool=pool, latent_mask=latent_mask,
                inject_latent=inject_latent, alpha=alpha)
            result_latent = codes

        # TODO(synk): arcface/LPIPS/SSIM sign-gradient refinement of w' is not
        # translatable without pretrained nets + autograd; x_hat == decoder(codes).
        x_hat = images

        if return_latents:
            return x_hat, result_latent
        return x_hat


# ----------------------------------------------------------------------------
if __name__ == "__main__":
    model = PSPPallas(output_size=16, in_channels=3, style_dim=128,
                      hidden=256, pooled_size=8, seed=0)

    key = jax.random.PRNGKey(0)
    x = jax.random.normal(key, (2, 3, 16, 16), dtype=jnp.float32)  # NCHW
    id_loss_threshold = 0.5

    # default path: fused encoder+decoder kernel
    out, latents = model.forward(x, id_loss_threshold, return_latents=True)
    out = jax.block_until_ready(out)
    latents = jax.block_until_ready(latents)
    assert out.shape == (2, 3, 16, 16)
    assert latents.shape == (2, model.n_styles, 128)
    assert bool(jnp.all(jnp.isfinite(out))) and bool(jnp.all(jnp.isfinite(latents)))

    # `not resize` path: fused encoder+decoder+face_pool kernel
    pooled = jax.block_until_ready(model.forward(x, id_loss_threshold, resize=False))
    assert pooled.shape == (2, 3, 8, 8)
    ref_pool = out.reshape(2, 3, 8, 2, 8, 2).mean(axis=(3, 5))
    assert bool(jnp.allclose(pooled, ref_pool, atol=1e-5, rtol=1e-5))

    # latent-mask editing path: fused encoder+edit+decoder kernel
    edited = jax.block_until_ready(
        model.forward(x, id_loss_threshold, latent_mask=[1, 3]))
    assert edited.shape == (2, 3, 16, 16)
    assert bool(jnp.all(jnp.isfinite(edited)))

    # input_code path: decoder-only kernel
    direct = jax.block_until_ready(model.forward(latents, id_loss_threshold,
                                                 input_code=True))
    assert direct.shape == (2, 3, 16, 16)
    assert bool(jnp.all(jnp.isfinite(direct)))

    print("KERNEL_OK")
</pallas_src>

<mosaic_0001>
module attributes {stable_mosaic.version = 11 : i64} {
  func.func @kernel(%arg0: i32, %arg1: memref<16x768xf32, #tpu.memory_space<vmem>>, %arg2: memref<768x256xi8, #tpu.memory_space<vmem>>, %arg3: memref<1x256xf32, #tpu.memory_space<vmem>>, %arg4: memref<1x256xf32, #tpu.memory_space<vmem>>, %arg5: memref<256x768xi8, #tpu.memory_space<vmem>>, %arg6: memref<1x768xf32, #tpu.memory_space<vmem>>, %arg7: memref<1x768xf32, #tpu.memory_space<vmem>>, %arg8: memref<768x768xi8, #tpu.memory_space<vmem>>, %arg9: memref<1x768xf32, #tpu.memory_space<vmem>>, %arg10: memref<1x768xf32, #tpu.memory_space<vmem>>, %arg11: memref<16x768xf32, #tpu.memory_space<vmem>>, %arg12: memref<16x768xf32, #tpu.memory_space<vmem>>) attributes {dimension_semantics = [#tpu.dimension_semantics<parallel>], iteration_bounds = array<i64: 1>, scalar_prefetch = 0 : i64, scratch_operands = 0 : i64, tpu.core_type = #tpu.core_type<tc>, window_params = [{transform_indices = @transform_0, window_bounds = array<i64: 16, 768>}, {pipeline_mode = #tpu.pipeline_mode<synchronous>, transform_indices = @transform_1, window_bounds = array<i64: 768, 256>}, {pipeline_mode = #tpu.pipeline_mode<synchronous>, transform_indices = @transform_2, window_bounds = array<i64: 1, 256>}, {pipeline_mode = #tpu.pipeline_mode<synchronous>, transform_indices = @transform_3, window_bounds = array<i64: 1, 256>}, {pipeline_mode = #tpu.pipeline_mode<synchronous>, transform_indices = @transform_4, window_bounds = array<i64: 256, 768>}, {pipeline_mode = #tpu.pipeline_mode<synchronous>, transform_indices = @transform_5, window_bounds = array<i64: 1, 768>}, {pipeline_mode = #tpu.pipeline_mode<synchronous>, transform_indices = @transform_6, window_bounds = array<i64: 1, 768>}, {pipeline_mode = #tpu.pipeline_mode<synchronous>, transform_indices = @transform_7, window_bounds = array<i64: 768, 768>}, {pipeline_mode = #tpu.pipeline_mode<synchronous>, transform_indices = @transform_8, window_bounds = array<i64: 1, 768>}, {pipeline_mode = #tpu.pipeline_mode<synchronous>, transform_indices = @transform_9, window_bounds = array<i64: 1, 768>}, {transform_indices = @transform_10, window_bounds = array<i64: 16, 768>}, {transform_indices = @transform_11, window_bounds = array<i64: 16, 768>}]} {
    %c0 = arith.constant 0 : index
    %c0_0 = arith.constant 0 : index
    %0 = vector.load %arg1[%c0, %c0_0] : memref<16x768xf32, #tpu.memory_space<vmem>>, vector<16x768xf32>
    %1 = arith.truncf %0 : vector<16x768xf32> to vector<16x768xbf16>
    %c0_1 = arith.constant 0 : index
    %c0_2 = arith.constant 0 : index
    %2 = vector.load %arg2[%c0_1, %c0_2] : memref<768x256xi8, #tpu.memory_space<vmem>>, vector<768x256xi8>
    %3 = arith.sitofp %2 : vector<768x256xi8> to vector<768x256xf32>
    %4 = arith.truncf %3 : vector<768x256xf32> to vector<768x256xbf16>
    %cst = arith.constant dense<0.000000e+00> : vector<16x256xf32>
    %5 = tpu.matmul %1, %4, %cst {dimension_numbers = #tpu.dot_dimension_numbers<[1], [0], [0], [1], [0, 0, 1, 1], [], []>} : vector<16x768xbf16>, vector<768x256xbf16>, vector<16x256xf32> -> vector<16x256xf32>
    %c0_3 = arith.constant 0 : index
    %c0_4 = arith.constant 0 : index
    %6 = vector.load %arg3[%c0_3, %c0_4] : memref<1x256xf32, #tpu.memory_space<vmem>>, vector<1x256xf32>
    %7 = vector.broadcast %6 : vector<1x256xf32> to vector<16x256xf32>
    %8 = arith.mulf %5, %7 : vector<16x256xf32>
    %c0_5 = arith.constant 0 : index
    %c0_6 = arith.constant 0 : index
    %9 = vector.load %arg4[%c0_5, %c0_6] : memref<1x256xf32, #tpu.memory_space<vmem>>, vector<1x256xf32>
    %10 = vector.broadcast %9 : vector<1x256xf32> to vector<16x256xf32>
    %11 = arith.addf %8, %10 : vector<16x256xf32>
    %cst_7 = arith.constant 0.000000e+00 : f32
    %12 = vector.broadcast %cst_7 : f32 to vector<16x256xf32>
    %13 = arith.maximumf %11, %12 : vector<16x256xf32>
    %14 = arith.truncf %13 : vector<16x256xf32> to vector<16x256xbf16>
    %c0_8 = arith.constant 0 : index
    %c0_9 = arith.constant 0 : index
    %15 = vector.load %arg5[%c0_8, %c0_9] : memref<256x768xi8, #tpu.memory_space<vmem>>, vector<256x768xi8>
    %16 = arith.sitofp %15 : vector<256x768xi8> to vector<256x768xf32>
    %17 = arith.truncf %16 : vector<256x768xf32> to vector<256x768xbf16>
    %cst_10 = arith.constant dense<0.000000e+00> : vector<16x768xf32>
    %18 = tpu.matmul %14, %17, %cst_10 {dimension_numbers = #tpu.dot_dimension_numbers<[1], [0], [0], [1], [0, 0, 1, 1], [], []>} : vector<16x256xbf16>, vector<256x768xbf16>, vector<16x768xf32> -> vector<16x768xf32>
    %c0_11 = arith.constant 0 : index
    %c0_12 = arith.constant 0 : index
    %19 = vector.load %arg6[%c0_11, %c0_12] : memref<1x768xf32, #tpu.memory_space<vmem>>, vector<1x768xf32>
    %20 = vector.broadcast %19 : vector<1x768xf32> to vector<16x768xf32>
    %21 = arith.mulf %18, %20 : vector<16x768xf32>
    %c0_13 = arith.constant 0 : index
    %c0_14 = arith.constant 0 : index
    %22 = vector.load %arg7[%c0_13, %c0_14] : memref<1x768xf32, #tpu.memory_space<vmem>>, vector<1x768xf32>
    %23 = vector.broadcast %22 : vector<1x768xf32> to vector<16x768xf32>
    %24 = arith.addf %21, %23 : vector<16x768xf32>
    %c0_15 = arith.constant 0 : index
    %c0_16 = arith.constant 0 : index
    %25 = vector.load %arg11[%c0_15, %c0_16] : memref<16x768xf32, #tpu.memory_space<vmem>>, vector<16x768xf32>
    tpu.vector_store %arg11[%c0_15, %c0_16], %24 {strides = array<i32>} : memref<16x768xf32, #tpu.memory_space<vmem>>, vector<16x768xf32>,
    %26 = arith.truncf %24 : vector<16x768xf32> to vector<16x768xbf16>
    %c0_17 = arith.constant 0 : index
    %c0_18 = arith.constant 0 : index
    %27 = vector.load %arg8[%c0_17, %c0_18] : memref<768x768xi8, #tpu.memory_space<vmem>>, vector<768x768xi8>
    %28 = arith.sitofp %27 : vector<768x768xi8> to vector<768x768xf32>
    %29 = arith.truncf %28 : vector<768x768xf32> to vector<768x768xbf16>
    %cst_19 = arith.constant dense<0.000000e+00> : vector<16x768xf32>
    %30 = tpu.matmul %26, %29, %cst_19 {dimension_numbers = #tpu.dot_dimension_numbers<[1], [0], [0], [1], [0, 0, 1, 1], [], []>} : vector<16x768xbf16>, vector<768x768xbf16>, vector<16x768xf32> -> vector<16x768xf32>
    %c0_20 = arith.constant 0 : index
    %c0_21 = arith.constant 0 : index
    %31 = vector.load %arg9[%c0_20, %c0_21] : memref<1x768xf32, #tpu.memory_space<vmem>>, vector<1x768xf32>
    %32 = vector.broadcast %31 : vector<1x768xf32> to vector<16x768xf32>
    %33 = arith.mulf %30, %32 : vector<16x768xf32>
    %c0_22 = arith.constant 0 : index
    %c0_23 = arith.constant 0 : index
    %34 = vector.load %arg10[%c0_22, %c0_23] : memref<1x768xf32, #tpu.memory_space<vmem>>, vector<1x768xf32>
    %35 = vector.broadcast %34 : vector<1x768xf32> to vector<16x768xf32>
    %36 = arith.addf %33, %35 : vector<16x768xf32>
    %37 = math.tanh %36 : vector<16x768xf32>
    %c0_24 = arith.constant 0 : index
    %c0_25 = arith.constant 0 : index
    %38 = vector.load %arg12[%c0_24, %c0_25] : memref<16x768xf32, #tpu.memory_space<vmem>>, vector<16x768xf32>
    tpu.vector_store %arg12[%c0_24, %c0_25], %37 {strides = array<i32>} : memref<16x768xf32, #tpu.memory_space<vmem>>, vector<16x768xf32>,
    return
  }
  func.func @transform_0(%arg0: i32) -> (i32, i32) {
    %c0_i32 = arith.constant 0 : i32
    %c0_i32_0 = arith.constant 0 : i32
    return %arg0, %c0_i32 : i32, i32
  }
  func.func @transform_1(%arg0: i32) -> (i32, i32) {
    %c0_i32 = arith.constant 0 : i32
    %c0_i32_0 = arith.constant 0 : i32
    %c0_i32_1 = arith.constant 0 : i32
    return %c0_i32, %c0_i32_0 : i32, i32
  }
  func.func @transform_2(%arg0: i32) -> (i32, i32) {
    %c0_i32 = arith.constant 0 : i32
    %c0_i32_0 = arith.constant 0 : i32
    %c0_i32_1 = arith.constant 0 : i32
    return %c0_i32, %c0_i32_0 : i32, i32
  }
  func.func @transform_3(%arg0: i32) -> (i32, i32) {
    %c0_i32 = arith.constant 0 : i32
    %c0_i32_0 = arith.constant 0 : i32
    %c0_i32_1 = arith.constant 0 : i32
    return %c0_i32, %c0_i32_0 : i32, i32
  }
  func.func @transform_4(%arg0: i32) -> (i32, i32) {
    %c0_i32 = arith.constant 0 : i32
    %c0_i32_0 = arith.constant 0 : i32
    %c0_i32_1 = arith.constant 0 : i32
    return %c0_i32, %c0_i32_0 : i32, i32
  }
  func.func @transform_5(%arg0: i32) -> (i32, i32) {
    %c0_i32 = arith.constant 0 : i32
    %c0_i32_0 = arith.constant 0 : i32
    %c0_i32_1 = arith.constant 0 : i32
    return %c0_i32, %c0_i32_0 : i32, i32
  }
  func.func @transform_6(%arg0: i32) -> (i32, i32) {
    %c0_i32 = arith.constant 0 : i32
    %c0_i32_0 = arith.constant 0 : i32
    %c0_i32_1 = arith.constant 0 : i32
    return %c0_i32, %c0_i32_0 : i32, i32
  }
  func.func @transform_7(%arg0: i32) -> (i32, i32) {
    %c0_i32 = arith.constant 0 : i32
    %c0_i32_0 = arith.constant 0 : i32
    %c0_i32_1 = arith.constant 0 : i32
    return %c0_i32, %c0_i32_0 : i32, i32
  }
  func.func @transform_8(%arg0: i32) -> (i32, i32) {
    %c0_i32 = arith.constant 0 : i32
    %c0_i32_0 = arith.constant 0 : i32
    %c0_i32_1 = arith.constant 0 : i32
    return %c0_i32, %c0_i32_0 : i32, i32
  }
  func.func @transform_9(%arg0: i32) -> (i32, i32) {
    %c0_i32 = arith.constant 0 : i32
    %c0_i32_0 = arith.constant 0 : i32
    %c0_i32_1 = arith.constant 0 : i32
    return %c0_i32, %c0_i32_0 : i32, i32
  }
  func.func @transform_10(%arg0: i32) -> (i32, i32) {
    %c0_i32 = arith.constant 0 : i32
    %c0_i32_0 = arith.constant 0 : i32
    return %arg0, %c0_i32 : i32, i32
  }
  func.func @transform_11(%arg0: i32) -> (i32, i32) {
    %c0_i32 = arith.constant 0 : i32
    %c0_i32_0 = arith.constant 0 : i32
    return %arg0, %c0_i32 : i32, i32
  }
}

</mosaic_0001>

<bundles_post_ra>
// kernel: _fused_forward_impl.1
= control target key start
LH: loop header
LB: loop body
LE: loop exit
PB: predicated region body
PF: predicated region fallthrough
CT: control target
= control target key end

     0   :  { %17 = vsyncpa [#allocation3], 0  ;;  %s2155_s0 = inlined_call_operand.vmem [shape: f32[16,768], index: 0, kind: input, shape index: {}]   ;;  %s2156_s1 = inlined_call_operand.hbm [shape: s8[768,256], index: 1, kind: input, shape index: {}]   ;;  %s2157_s2 = inlined_call_operand.vmem [shape: f32[1,256], index: 2, kind: input, shape index: {}]   ;;  %s2158_s3 = inlined_call_operand.vmem [shape: f32[1,256], index: 3, kind: input, shape index: {}]   ;;  %s2159_s4 = inlined_call_operand.hbm [shape: s8[256,768], index: 4, kind: input, shape index: {}]   ;;  %s2160_s5 = inlined_call_operand.vmem [shape: f32[1,768], index: 5, kind: input, shape index: {}]   ;;  %s2161_s6 = inlined_call_operand.vmem [shape: f32[1,768], index: 6, kind: input, shape index: {}]   ;;  %s2162_s7 = inlined_call_operand.hbm [shape: s8[768,768], index: 7, kind: input, shape index: {}]   ;;  %s2163_s8 = inlined_call_operand.vmem [shape: f32[1,768], index: 8, kind: input, shape index: {}]   ;;  %s2164_s9 = inlined_call_operand.vmem [shape: f32[1,768], index: 9, kind: input, shape index: {}]   ;;  %s2165_s10 = inlined_call_operand.vmem [shape: f32[16,768], index: 10, kind: output, shape index: {0}]   ;;  %s2166_s11 = inlined_call_operand.vmem [shape: f32[16,768], index: 11, kind: output, shape index: {1}]  }
   0x1   :  { %18 = vsyncpa [#allocation5], 0  ;;  %s1822_s17 = smov [#allocation4]  }
   0x2   :  { %s42_s18 = sshll.u32 %s1822_s17, 4  ;;  %s43_s18 = int_to_ptr.vmem [resolvable:$true] %s42_s18 }
   0x3   :  { %s1766_s19 = scalar_lea.vmem %s43_s18, 6144  ;;  %p1771_p1 = scmp.lt.s32.totalorder %s43_s18, %s43_s18 }
   0x4   :  { %p1767_p0 = scmp.ne.s32.totalorder %s43_s18, %s1766_s19  ;;  %p1772_p2 = scmp.lt.s32.totalorder %s1766_s19, %s1766_s19 }
   0x6   :  { %p1773_p3 = por %p1772_p2, %p1771_p1 }
   0x8   :  { %p1774_p4 = pnand %p1773_p3, %p1767_p0 }
   0xa   :  { %1777 = shalt.err (!%p1774_p4)
}
   0xb   :  { %s1823_s20 = smov 768   ;;  %s1824_s21 = smov 48  }
   0xc   :  { %48 = dma.hbm_to_vmem [thread:$0]  %s2159_s4, 6144, %s43_s18, [#allocation5], %s1823_s20, %s1823_s20, %s1824_s21  }
   0xd   :  { %s1825_s24 = smov [#allocation2]  }
   0xe   :  { %s26_s25 = sshll.u32 %s1825_s24, 4  ;;  %s27_s25 = int_to_ptr.vmem [resolvable:$true] %s26_s25 }
   0xf   :  { %s1786_s26 = scalar_lea.vmem %s27_s25, 6144  ;;  %p1791_p6 = scmp.lt.s32.totalorder %s27_s25, %s27_s25 }
  0x10   :  { %p1787_p5 = scmp.ne.s32.totalorder %s27_s25, %s1786_s26  ;;  %p1792_p7 = scmp.lt.s32.totalorder %s1786_s26, %s1786_s26 }
  0x12   :  { %p1793_p8 = por %p1792_p7, %p1791_p6 }
  0x14   :  { %p1794_p9 = pnand %p1793_p8, %p1787_p5 }
  0x16   :  { %1797 = shalt.err (!%p1794_p9)
}
  0x17   :  { %s1826_s27 = smov 256   ;;  %s1827_s28 = smov 16  }
  0x18   :  { %32 = dma.hbm_to_vmem [thread:$0]  %s2156_s1, 6144, %s27_s25, [#allocation3], %s1826_s27, %s1826_s27, %s1827_s28  }
  0x19   :  { %s1828_s12 = smov [#allocation6]  }
  0x1a   :  { %s58_s13 = sshll.u32 %s1828_s12, 4  ;;  %s59_s13 = int_to_ptr.vmem [resolvable:$true] %s58_s13 }
  0x1b   :  { %s1806_s4 = scalar_lea.vmem %s59_s13, 18432  ;;  %p1811_p11 = scmp.lt.s32.totalorder %s59_s13, %s59_s13 }
  0x1c   :  { %p1807_p10 = scmp.ne.s32.totalorder %s59_s13, %s1806_s4  ;;  %p1812_p12 = scmp.lt.s32.totalorder %s1806_s4, %s1806_s4 }
  0x1e   :  { %p1813_p13 = por %p1812_p12, %p1811_p11 }
  0x20   :  { %p1814_p0 = pnand %p1813_p13, %p1807_p10 }
  0x22   :  { %1817 = shalt.err (!%p1814_p0)
}
  0x23   :  { %64 = dma.hbm_to_vmem [thread:$0]  %s2162_s7, 18432, %s59_s13, [#allocation5], %s1823_s20, %s1823_s20, %s1824_s21  }
  0x24   :  { %1818 = dma.done.wait [#allocation3], 6144  }
  0x25   :  { %1819 = vsyncadd [#allocation3], 4294961152 }
  0x26   :  { %1820 = dma.done.wait [#allocation5], 24576  }
  0x27   :  { %1821 = vsyncadd [#allocation5], 4294942720  ;;  %v103_v0 = vld [vmem:[#allocation2 + $0x38] sm:$0xff]  ;;  %v102_v2 = vld [vmem:[#allocation2 + $0x30] sm:$0xff] }
  0x28   :  { %v119_v1 = vld [vmem:[#allocation2 + $0xb8] sm:$0xff]  ;;  %v157_v3 = vunpack.c.l.s8.bf16 %v103_v0  ;;  %v159_v4 = vunpack.c.h.s8.bf16 %v103_v0  ;;  %v118_v7 = vld [vmem:[#allocation2 + $0xb0] sm:$0xff]  ;;  %v158_v8 = vunpack.c.h.s8.bf16 %v102_v2  ;;  %v101_v10 = vld [vmem:[#allocation2 + $0x28] sm:$0xff]  ;;  %v156_v12 = vunpack.c.l.s8.bf16 %v102_v2 }
  0x29   :  { %v189_v5 = vunpack.c.l.s8.bf16 %v119_v1  ;;  %v191_v6 = vunpack.c.h.s8.bf16 %v119_v1  ;;  %v190_v9 = vunpack.c.h.s8.bf16 %v118_v7  ;;  %v117_v11 = vld [vmem:[#allocation2 + $0xa8] sm:$0xff]  ;;  %v188_v13 = vunpack.c.l.s8.bf16 %v118_v7  ;;  %v100_v16 = vld [vmem:[#allocation2 + $0x20] sm:$0xff]  ;;  %v99_v22 = vld [vmem:[#allocation2 + $0x18] sm:$0xff] }
  0x2a   :  { %240 = vmatprep.subr.bf16.mxu0 %v159_v4  ;;  %v155_v14 = vunpack.c.h.s8.bf16 %v101_v10  ;;  %v187_v15 = vunpack.c.h.s8.bf16 %v117_v11  ;;  %v116_v17 = vld [vmem:[#allocation2 + $0xa0] sm:$0xff]  ;;  %v154_v18 = vunpack.c.h.s8.bf16 %v100_v16  ;;  %v153_v20 = vunpack.c.l.s8.bf16 %v101_v10  ;;  %v115_v23 = vld [vmem:[#allocation2 + $0x98] sm:$0xff]  ;;  %v98_v28 = vld [vmem:[#allocation2 + $0x10] sm:$0xff] }
  0x2b   :  { %283 = vmatprep.subr.bf16.mxu1 %v191_v6  ;;  %241 = vmatpush1.bf16.msra.mxu0 %v158_v8  ;;  %v186_v19 = vunpack.c.h.s8.bf16 %v116_v17  ;;  %v185_v21 = vunpack.c.l.s8.bf16 %v117_v11  ;;  %v152_v24 = vunpack.c.l.s8.bf16 %v100_v16  ;;  %v184_v25 = vunpack.c.l.s8.bf16 %v116_v17  ;;  %v114_v29 = vld [vmem:[#allocation2 + $0x90] sm:$0xff]  ;;  %v79_v30 = vld [vmem:[%s2155_s0 + $0x8] sm:$0xff]  ;;  %v85_v31 = vld [vmem:[%s2155_s0 + $0x38] sm:$0xff] }
  0x2c   :  { %284 = vmatpush1.bf16.msra.mxu1 %v190_v9  ;;  %242 = vmatprep.subr.bf16.mxu0 %v157_v3  ;;  %v151_v26 = vunpack.c.h.s8.bf16 %v99_v22  ;;  %v183_v27 = vunpack.c.h.s8.bf16 %v115_v23  ;;  %v81_v32 = vld [vmem:[%s2155_s0 + $0x18] sm:$0xff]  ;;  %v87_v33 = vld [vmem:[%s2155_s0 + $0x48] sm:$0xff]  ;;  %v150_v34 = vunpack.c.h.s8.bf16 %v98_v28  ;;  %v182_v35 = vunpack.c.h.s8.bf16 %v114_v29  ;;  %v96_v46 = vld [vmem:[#allocation2] sm:$0xff] }
  0x2d   :  { %285 = vmatprep.subr.bf16.mxu1 %v189_v5  ;;  %v149_v36 = vunpack.c.l.s8.bf16 %v99_v22  ;;  %v181_v37 = vunpack.c.l.s8.bf16 %v115_v23  ;;  %v91_v38 = vpack.c.bf16 %v85_v31, %v79_v30  ;;  %v93_v39 = vpack.c.bf16 %v87_v33, %v81_v32  ;;  %v97_v40 = vld [vmem:[#allocation2 + $0x8] sm:$0xff]  ;;  %v112_v47 = vld [vmem:[#allocation2 + $0x80] sm:$0xff]  ;;  %v111_v52 = vld [vmem:[#allocation2 + $0x78] sm:$0xff] }
  0x2e   :  { %v113_v41 = vld [vmem:[#allocation2 + $0x88] sm:$0xff]  ;;  %v148_v42 = vunpack.c.l.s8.bf16 %v98_v28  ;;  %v180_v43 = vunpack.c.l.s8.bf16 %v114_v29  ;;  %v147_v44 = vunpack.c.h.s8.bf16 %v97_v40  ;;  %v146_v48 = vunpack.c.h.s8.bf16 %v96_v46  ;;  %v127_v53 = vld [vmem:[#allocation2 + $0xf8] sm:$0xff]  ;;  %v110_v58 = vld [vmem:[#allocation2 + $0x70] sm:$0xff] }
  0x2f   :  { %243 = vmatpush1.bf16.msra.mxu0 %v156_v12  ;;  %272 = vmatprep.mubr.bf16.mxu0 %v91_v38  ;;  %v179_v45 = vunpack.c.h.s8.bf16 %v113_v41  ;;  %v178_v49 = vunpack.c.h.s8.bf16 %v112_v47  ;;  %v145_v50 = vunpack.c.l.s8.bf16 %v97_v40  ;;  %v177_v51 = vunpack.c.l.s8.bf16 %v113_v41  ;;  %v126_v59 = vld [vmem:[#allocation2 + $0xf0] sm:$0xff]  ;;  %v109_v0 = vld [vmem:[#allocation2 + $0x68] sm:$0xff]  ;;  %v108_v6 = vld [vmem:[#allocation2 + $0x60] sm:$0xff] }
  0x30   :  { %286 = vmatpush1.bf16.msra.mxu1 %v188_v13  ;;  %244 = vmatprep.subr.bf16.mxu0 %v155_v14  ;;  %v144_v54 = vunpack.c.l.s8.bf16 %v96_v46  ;;  %v176_v55 = vunpack.c.l.s8.bf16 %v112_v47  ;;  %v175_v56 = vunpack.c.h.s8.bf16 %v111_v52  ;;  %v207_v57 = vunpack.c.h.s8.bf16 %v127_v53  ;;  %v125_v1 = vld [vmem:[#allocation2 + $0xe8] sm:$0xff]  ;;  %v124_v7 = vld [vmem:[#allocation2 + $0xe0] sm:$0xff]  ;;  %v107_v12 = vld [vmem:[#allocation2 + $0x58] sm:$0xff] }
  0x31   :  { %287 = vmatprep.subr.bf16.mxu1 %v187_v15  ;;  %315 = vmatprep.mubr.bf16.mxu1 %v93_v39  ;;  %v174_v60 = vunpack.c.h.s8.bf16 %v110_v58  ;;  %v206_v61 = vunpack.c.h.s8.bf16 %v126_v59  ;;  %v173_v62 = vunpack.c.l.s8.bf16 %v111_v52  ;;  %v205_v63 = vunpack.c.l.s8.bf16 %v127_v53  ;;  %v123_v13 = vld [vmem:[#allocation2 + $0xd8] sm:$0xff]  ;;  %v104_v30 = vld [vmem:[#allocation2 + $0x40] sm:$0xff]  ;;  %v84_v40 = vld [vmem:[%s2155_s0 + $0x30] sm:$0xff] }
  0x32   :  { %v172_v2 = vunpack.c.l.s8.bf16 %v110_v58  ;;  %v204_v3 = vunpack.c.l.s8.bf16 %v126_v59  ;;  %v171_v4 = vunpack.c.h.s8.bf16 %v109_v0  ;;  %v203_v5 = vunpack.c.h.s8.bf16 %v125_v1  ;;  %v120_v31 = vld [vmem:[#allocation2 + $0xc0] sm:$0xff]  ;;  %v80_v41 = vld [vmem:[%s2155_s0 + $0x10] sm:$0xff]  ;;  %v89_v46 = vld [vmem:[%s2155_s0 + $0x58] sm:$0xff] }
  0x33   :  { %245 = vmatpush1.bf16.msra.mxu0 %v154_v18  ;;  %v170_v8 = vunpack.c.h.s8.bf16 %v108_v6  ;;  %v202_v9 = vunpack.c.h.s8.bf16 %v124_v7  ;;  %v169_v10 = vunpack.c.l.s8.bf16 %v109_v0  ;;  %v201_v11 = vunpack.c.l.s8.bf16 %v125_v1  ;;  %v106_v18 = vld [vmem:[#allocation2 + $0x50] sm:$0xff]  ;;  %v133_v52 = vld [vmem:[#allocation2 + $0x128] sm:$0xff]  ;;  %v131_v58 = vld [vmem:[#allocation2 + $0x118] sm:$0xff] }
  0x34   :  { %288 = vmatpush1.bf16.msra.mxu1 %v186_v19  ;;  %246 = vmatprep.subr.bf16.mxu0 %v153_v20  ;;  %v168_v14 = vunpack.c.l.s8.bf16 %v108_v6  ;;  %v200_v15 = vunpack.c.l.s8.bf16 %v124_v7  ;;  %v167_v16 = vunpack.c.h.s8.bf16 %v107_v12  ;;  %v199_v17 = vunpack.c.h.s8.bf16 %v123_v13  ;;  %v122_v19 = vld [vmem:[#allocation2 + $0xd0] sm:$0xff]  ;;  %v129_v0 = vld [vmem:[#allocation2 + $0x108] sm:$0xff]  ;;  %v143_v6 = vld [vmem:[#allocation2 + $0x178] sm:$0xff] }
  0x35   :  { %289 = vmatprep.subr.bf16.mxu1 %v185_v21  ;;  %v166_v20 = vunpack.c.h.s8.bf16 %v106_v18  ;;  %v198_v21 = vunpack.c.h.s8.bf16 %v122_v19  ;;  %v165_v22 = vunpack.c.l.s8.bf16 %v107_v12  ;;  %v197_v23 = vunpack.c.l.s8.bf16 %v123_v13  ;;  %v141_v12 = vld [vmem:[#allocation2 + $0x168] sm:$0xff] }
  0x36   :  { %v162_v32 = vunpack.c.h.s8.bf16 %v104_v30  ;;  %v194_v33 = vunpack.c.h.s8.bf16 %v120_v31  ;;  %v160_v38 = vunpack.c.l.s8.bf16 %v104_v30  ;;  %v192_v39 = vunpack.c.l.s8.bf16 %v120_v31  ;;  %v82_v31 = vld [vmem:[%s2155_s0 + $0x20] sm:$0xff] }
  0x37   :  { %247 = vmatpush1.bf16.msra.mxu0 %v152_v24  ;;  %v105_v24 = vld [vmem:[#allocation2 + $0x48] sm:$0xff] }
  0x38   :  { %290 = vmatpush1.bf16.msra.mxu1 %v184_v25  ;;  %248 = vmatprep.subr.bf16.mxu0 %v151_v26  ;;  %v121_v25 = vld [vmem:[#allocation2 + $0xc8] sm:$0xff]  ;;  %v164_v26 = vunpack.c.l.s8.bf16 %v106_v18  ;;  %v163_v28 = vunpack.c.h.s8.bf16 %v105_v24  ;;  %v139_v18 = vld [vmem:[#allocation2 + $0x158] sm:$0xff] }
  0x39   :  { %291 = vmatprep.subr.bf16.mxu1 %v183_v27  ;;  %v196_v27 = vunpack.c.l.s8.bf16 %v122_v19  ;;  %v195_v29 = vunpack.c.h.s8.bf16 %v121_v25 }
  0x3b   :  { %249 = vmatpush1.bf16.msra.mxu0 %v150_v34  ;;  %v161_v34 = vunpack.c.l.s8.bf16 %v105_v24  ;;  %v137_v24 = vld [vmem:[#allocation2 + $0x148] sm:$0xff] }
  0x3c   :  { %292 = vmatpush1.bf16.msra.mxu1 %v182_v35  ;;  %250 = vmatprep.subr.bf16.mxu0 %v149_v36  ;;  %v193_v35 = vunpack.c.l.s8.bf16 %v121_v25  ;;  %v135_v36 = vld [vmem:[#allocation2 + $0x138] sm:$0xff] }
  0x3d   :  { %293 = vmatprep.subr.bf16.mxu1 %v181_v37  ;;  %v78_v37 = vld [vmem:[%s2155_s0] sm:$0xff] }
  0x3e   :  { %v90_v47 = vpack.c.bf16 %v84_v40, %v78_v37  ;;  %v427_v40 = vld [vmem:[#allocation4 + $0xa0] sm:$0xff] }
  0x3f   :  { %251 = vmatpush1.bf16.msra.mxu0 %v148_v42  ;;  %v86_v42 = vld [vmem:[%s2155_s0 + $0x40] sm:$0xff] }
  0x40   :  { %294 = vmatpush1.bf16.msra.mxu1 %v180_v43  ;;  %252 = vmatprep.subr.bf16.mxu0 %v147_v44  ;;  %v223_v43 = vunpack.c.h.s8.bf16 %v135_v36  ;;  %v134_v44 = vld [vmem:[#allocation2 + $0x130] sm:$0xff] }
  0x41   :  { %295 = vmatprep.subr.bf16.mxu1 %v179_v45  ;;  %v83_v45 = vld [vmem:[%s2155_s0 + $0x28] sm:$0xff]  ;;  %v220_v53 = vunpack.c.l.s8.bf16 %v134_v44 }
  0x43   :  { %253 = vmatpush1.bf16.msra.mxu0 %v146_v48  ;;  %v92_v48 = vpack.c.bf16 %v86_v42, %v80_v41  ;;  %v499_v42 = vunpack.c.h.s8.bf16 %v427_v40 }
  0x44   :  { %296 = vmatpush1.bf16.msra.mxu1 %v178_v49  ;;  %254 = vmatprep.subr.bf16.mxu0 %v145_v50  ;;  %v222_v49 = vunpack.c.h.s8.bf16 %v134_v44  ;;  %v95_v50 = vpack.c.bf16 %v89_v46, %v83_v45  ;;  %v420_v44 = vld [vmem:[#allocation4 + $0x68] sm:$0xff]  ;;  %v422_v45 = vld [vmem:[#allocation4 + $0x78] sm:$0xff] }
  0x45   :  { %297 = vmatprep.subr.bf16.mxu1 %v177_v51  ;;  %v221_v51 = vunpack.c.l.s8.bf16 %v135_v36  ;;  %v428_v36 = vld [vmem:[#allocation4 + $0xa8] sm:$0xff] }
  0x47   :  { %255 = vmatpush1.bf16.msra.mxu0 %v144_v54  ;;  %v219_v54 = vunpack.c.h.s8.bf16 %v133_v52 }
  0x48   :  { %298 = vmatpush1.bf16.msra.mxu1 %v176_v55  ;;  %256 = vmatprep.subr.bf16.mxu0 %v175_v56  ;;  %v132_v55 = vld [vmem:[#allocation2 + $0x120] sm:$0xff] }
  0x49   :  { %299 = vmatprep.subr.bf16.mxu1 %v207_v57  ;;  %v218_v56 = vunpack.c.h.s8.bf16 %v132_v55  ;;  %v217_v57 = vunpack.c.l.s8.bf16 %v133_v52  ;;  %v216_v59 = vunpack.c.l.s8.bf16 %v132_v55  ;;  %v482_v55 = vunpack.c.l.s8.bf16 %v422_v45 }
  0x4b   :  { %257 = vmatpush2.bf16.msra.mxu0 %v174_v60  ;;  %v215_v60 = vunpack.c.h.s8.bf16 %v131_v58 }
  0x4c   :  { %300 = vmatpush2.bf16.msra.mxu1 %v206_v61  ;;  %258 = vmatprep.subr.bf16.mxu0 %v173_v62  ;;  %v130_v61 = vld [vmem:[#allocation2 + $0x110] sm:$0xff] }
  0x4d   :  { %301 = vmatprep.subr.bf16.mxu1 %v205_v63  ;;  %v214_v62 = vunpack.c.h.s8.bf16 %v130_v61  ;;  %v213_v63 = vunpack.c.l.s8.bf16 %v131_v58  ;;  %v212_v1 = vunpack.c.l.s8.bf16 %v130_v61  ;;  %v413_v61 = vld [vmem:[#allocation4 + $0x30] sm:$0xff] }
  0x4f   :  { %259 = vmatpush2.bf16.msra.mxu0 %v172_v2  ;;  %v211_v2 = vunpack.c.h.s8.bf16 %v129_v0 }
  0x50   :  { %302 = vmatpush2.bf16.msra.mxu1 %v204_v3  ;;  %260 = vmatprep.subr.bf16.mxu0 %v171_v4  ;;  %v128_v3 = vld [vmem:[#allocation2 + $0x100] sm:$0xff] }
  0x51   :  { %303 = vmatprep.subr.bf16.mxu1 %v203_v5  ;;  %v210_v4 = vunpack.c.h.s8.bf16 %v128_v3  ;;  %v209_v5 = vunpack.c.l.s8.bf16 %v129_v0  ;;  %v208_v7 = vunpack.c.l.s8.bf16 %v128_v3  ;;  %v473_v0 = vunpack.c.h.s8.bf16 %v413_v61 }
  0x53   :  { %261 = vmatpush2.bf16.msra.mxu0 %v170_v8  ;;  %v239_v8 = vunpack.c.h.s8.bf16 %v143_v6 }
  0x54   :  { %304 = vmatpush2.bf16.msra.mxu1 %v202_v9  ;;  %262 = vmatprep.subr.bf16.mxu0 %v169_v10  ;;  %v142_v9 = vld [vmem:[#allocation2 + $0x170] sm:$0xff] }
  0x55   :  { %305 = vmatprep.subr.bf16.mxu1 %v201_v11  ;;  %v238_v10 = vunpack.c.h.s8.bf16 %v142_v9  ;;  %v237_v11 = vunpack.c.l.s8.bf16 %v143_v6  ;;  %v236_v13 = vunpack.c.l.s8.bf16 %v142_v9  ;;  %v467_v6 = vunpack.c.l.s8.bf16 %v413_v61  ;;  %v407_v9 = vld [vmem:[#allocation4] sm:$0xff] }
  0x57   :  { %263 = vmatpush2.bf16.msra.mxu0 %v168_v14  ;;  %v235_v14 = vunpack.c.h.s8.bf16 %v141_v12 }
  0x58   :  { %306 = vmatpush2.bf16.msra.mxu1 %v200_v15  ;;  %264 = vmatprep.subr.bf16.mxu0 %v167_v16  ;;  %v140_v15 = vld [vmem:[#allocation2 + $0x160] sm:$0xff] }
  0x59   :  { %307 = vmatprep.subr.bf16.mxu1 %v199_v17  ;;  %v234_v16 = vunpack.c.h.s8.bf16 %v140_v15  ;;  %v233_v17 = vunpack.c.l.s8.bf16 %v141_v12  ;;  %v232_v19 = vunpack.c.l.s8.bf16 %v140_v15  ;;  %v461_v12 = vunpack.c.h.s8.bf16 %v407_v9 }
  0x5b   :  { %265 = vmatpush2.bf16.msra.mxu0 %v166_v20  ;;  %v231_v20 = vunpack.c.h.s8.bf16 %v139_v18 }
  0x5c   :  { %308 = vmatpush2.bf16.msra.mxu1 %v198_v21  ;;  %266 = vmatprep.subr.bf16.mxu0 %v165_v22  ;;  %v138_v21 = vld [vmem:[#allocation2 + $0x150] sm:$0xff] }
  0x5d   :  { %309 = vmatprep.subr.bf16.mxu1 %v197_v23  ;;  %v230_v22 = vunpack.c.h.s8.bf16 %v138_v21  ;;  %v229_v23 = vunpack.c.l.s8.bf16 %v139_v18  ;;  %v228_v25 = vunpack.c.l.s8.bf16 %v138_v21  ;;  %v455_v18 = vunpack.c.l.s8.bf16 %v407_v9  ;;  %v449_v21 = vld [vmem:[#allocation4 + $0x150] sm:$0xff] }
  0x5e   :  { %v371_v9 = vlaneseq }
  0x5f   :  { %267 = vmatpush2.bf16.msra.mxu0 %v164_v26  ;;  %v227_v26 = vunpack.c.h.s8.bf16 %v137_v24 }
  0x60   :  { %310 = vmatpush2.bf16.msra.mxu1 %v196_v27  ;;  %268 = vmatprep.subr.bf16.mxu0 %v163_v28  ;;  %v136_v27 = vld [vmem:[#allocation2 + $0x140] sm:$0xff] }
  0x61   :  { %311 = vmatprep.subr.bf16.mxu1 %v195_v29  ;;  %v226_v28 = vunpack.c.h.s8.bf16 %v136_v27  ;;  %v225_v29 = vunpack.c.l.s8.bf16 %v137_v24  ;;  %v224_v30 = vunpack.c.l.s8.bf16 %v136_v27  ;;  %v545_v24 = vunpack.c.h.s8.bf16 %v449_v21 }
  0x63   :  { %269 = vmatpush2.bf16.msra.mxu0 %v162_v32  ;;  %v88_v32 = vld [vmem:[%s2155_s0 + $0x50] sm:$0xff] }
  0x64   :  { %312 = vmatpush2.bf16.msra.mxu1 %v194_v33  ;;  %270 = vmatprep.subr.bf16.mxu0 %v161_v34  ;;  %v94_v33 = vpack.c.bf16 %v88_v32, %v82_v31  ;;  %v426_v34 = vld [vmem:[#allocation4 + $0x98] sm:$0xff] }
  0x65   :  { %313 = vmatprep.subr.bf16.mxu1 %v193_v35  ;;  %v425_v35 = vld [vmem:[#allocation4 + $0x90] sm:$0xff]  ;;  %v498_v37 = vunpack.c.h.s8.bf16 %v426_v34  ;;  %v492_v41 = vunpack.c.l.s8.bf16 %v426_v34 }
  0x66   :  { %v491_v46 = vunpack.c.l.s8.bf16 %v425_v35 }
  0x67   :  { %271 = vmatpush2.bf16.msra.mxu0 %v160_v38  ;;  %v497_v38 = vunpack.c.h.s8.bf16 %v425_v35  ;;  %v445_v35 = vld [vmem:[#allocation4 + $0x130] sm:$0xff] }
  0x68   :  { %314 = vmatpush2.bf16.msra.mxu1 %v192_v39  ;;  %326 = vmatprep.subr.bf16.mxu0 %v223_v43  ;;  %v500_v39 = vunpack.c.h.s8.bf16 %v428_v36  ;;  %v494_v43 = vunpack.c.l.s8.bf16 %v428_v36 }
  0x69   :  { %551 = vmatprep.subr.bf16.mxu1 %v498_v37  ;;  %v535_v37 = vunpack.c.h.s8.bf16 %v445_v35 }
  0x6a   :  { %273 = vmatmul.mubr.bf16.vlgmr.msra.gmra.mxu0 %v90_v47  ;;  %v493_v47 = vunpack.c.l.s8.bf16 %v427_v40 }
  0x6b   :  { %316 = vmatmul.mubr.bf16.vlgmr.msra.gmra.mxu1 %v92_v48  ;;  %327 = vmatpush1.bf16.msra.mxu0 %v222_v49  ;;  %v486_v48 = vunpack.c.h.s8.bf16 %v420_v44  ;;  %v419_v49 = vld [vmem:[#allocation4 + $0x60] sm:$0xff] }
  0x6c   :  { %358 = vmatprep.mubr.bf16.mxu0 %v95_v50  ;;  %328 = vmatprep.subr.bf16.mxu0 %v221_v51  ;;  %v488_v50 = vunpack.c.h.s8.bf16 %v422_v45  ;;  %v421_v51 = vld [vmem:[#allocation4 + $0x70] sm:$0xff]  ;;  %v485_v52 = vunpack.c.h.s8.bf16 %v419_v49  ;;  %v479_v58 = vunpack.c.l.s8.bf16 %v419_v49  ;;  %v440_v45 = vld [vmem:[#allocation4 + $0x108] sm:$0xff] }
  0x6d   :  { %552 = vmatpush1.bf16.msra.mxu1 %v497_v38 }
  0x6e   :  { %553 = vmatprep.subr.bf16.mxu1 %v492_v41  ;;  %v529_v41 = vunpack.c.l.s8.bf16 %v445_v35 }
  0x6f   :  { %329 = vmatpush1.bf16.msra.mxu0 %v220_v53  ;;  %v487_v53 = vunpack.c.h.s8.bf16 %v421_v51 }
  0x70   :  { %330 = vmatprep.subr.bf16.mxu0 %v219_v54  ;;  %v480_v54 = vunpack.c.l.s8.bf16 %v420_v44  ;;  %v437_v44 = vld [vmem:[#allocation4 + $0xf0] sm:$0xff] }
  0x71   :  { %554 = vmatpush1.bf16.msra.mxu1 %v491_v46  ;;  %v521_v46 = vunpack.c.h.s8.bf16 %v437_v44 }
  0x72   :  { %555 = vmatprep.subr.bf16.mxu1 %v486_v48  ;;  %v439_v48 = vld [vmem:[#allocation4 + $0x100] sm:$0xff] }
  0x73   :  { %331 = vmatpush1.bf16.msra.mxu0 %v218_v56  ;;  %v414_v56 = vld [vmem:[#allocation4 + $0x38] sm:$0xff]  ;;  %v523_v49 = vunpack.c.h.s8.bf16 %v439_v48 }
  0x74   :  { %332 = vmatprep.subr.bf16.mxu0 %v217_v57  ;;  %v416_v57 = vld [vmem:[#allocation4 + $0x48] sm:$0xff] }
  0x75   :  { %556 = vmatpush1.bf16.msra.mxu1 %v485_v52  ;;  %v470_v3 = vunpack.c.l.s8.bf16 %v416_v57  ;;  %v518_v52 = vunpack.c.l.s8.bf16 %v440_v45 }
  0x76   :  { %557 = vmatprep.subr.bf16.mxu1 %v480_v54  ;;  %v432_v54 = vld [vmem:[#allocation4 + $0xc8] sm:$0xff] }
  0x77   :  { %333 = vmatpush1.bf16.msra.mxu0 %v216_v59  ;;  %v481_v59 = vunpack.c.l.s8.bf16 %v421_v51  ;;  %v515_v51 = vunpack.c.l.s8.bf16 %v437_v44 }
  0x78   :  { %334 = vmatprep.subr.bf16.mxu0 %v215_v60  ;;  %v474_v60 = vunpack.c.h.s8.bf16 %v414_v56 }
  0x79   :  { %558 = vmatpush1.bf16.msra.mxu1 %v479_v58 }
  0x7a   :  { %559 = vmatprep.subr.bf16.mxu1 %v474_v60  ;;  %v433_v60 = vld [vmem:[#allocation4 + $0xd0] sm:$0xff] }
  0x7b   :  { %335 = vmatpush1.bf16.msra.mxu0 %v214_v62  ;;  %v476_v62 = vunpack.c.h.s8.bf16 %v416_v57  ;;  %v434_v57 = vld [vmem:[#allocation4 + $0xd8] sm:$0xff]  ;;  %v511_v61 = vunpack.c.h.s8.bf16 %v433_v60 }
  0x7c   :  { %336 = vmatprep.subr.bf16.mxu0 %v213_v63  ;;  %v415_v63 = vld [vmem:[#allocation4 + $0x40] sm:$0xff] }
  0x7d   :  { %560 = vmatpush1.bf16.msra.mxu1 %v473_v0  ;;  %v506_v0 = vunpack.c.l.s8.bf16 %v434_v57 }
  0x7f   :  { %337 = vmatpush1.bf16.msra.mxu0 %v212_v1  ;;  %v475_v1 = vunpack.c.h.s8.bf16 %v415_v63 }
  0x80   :  { %338 = vmatprep.subr.bf16.mxu0 %v211_v2  ;;  %v468_v2 = vunpack.c.l.s8.bf16 %v414_v56  ;;  %v431_v56 = vld [vmem:[#allocation4 + $0xc0] sm:$0xff] }
  0x81   :  { %v509_v58 = vunpack.c.h.s8.bf16 %v431_v56 }
  0x82   :  { %561 = vmatprep.subr.bf16.mxu1 %v468_v2  ;;  %v1934_v2 = vld [vmem:[#allocation4 + $0xb8] sm:$0xff] }
  0x83   :  { %339 = vmatpush1.bf16.msra.mxu0 %v210_v4  ;;  %v408_v4 = vld [vmem:[#allocation4 + $0x8] sm:$0xff]  ;;  %562 = vmatpush1.bf16.msra.mxu1 %v467_v6 }
  0x84   :  { %340 = vmatprep.subr.bf16.mxu0 %v209_v5  ;;  %v410_v5 = vld [vmem:[#allocation4 + $0x18] sm:$0xff] }
  0x85   :  { %v458_v15 = vunpack.c.l.s8.bf16 %v410_v5 }
  0x87   :  { %341 = vmatpush1.bf16.msra.mxu0 %v208_v7  ;;  %v469_v7 = vunpack.c.l.s8.bf16 %v415_v63  ;;  %v503_v63 = vunpack.c.l.s8.bf16 %v431_v56 }
  0x88   :  { %342 = vmatprep.subr.bf16.mxu0 %v239_v8  ;;  %v462_v8 = vunpack.c.h.s8.bf16 %v408_v4 }
  0x8a   :  { %563 = vmatprep.subr.bf16.mxu1 %v462_v8 }
  0x8b   :  { %343 = vmatpush2.bf16.msra.mxu0 %v238_v10  ;;  %v464_v10 = vunpack.c.h.s8.bf16 %v410_v5  ;;  %564 = vmatpush1.bf16.msra.mxu1 %v461_v12  ;;  %v1940_v12 = vshrl.u32 %v371_v9, 7 }
  0x8c   :  { %344 = vmatprep.subr.bf16.mxu0 %v237_v11  ;;  %v409_v11 = vld [vmem:[#allocation4 + $0x10] sm:$0xff] }
  0x8f   :  { %345 = vmatpush2.bf16.msra.mxu0 %v236_v13  ;;  %v463_v13 = vunpack.c.h.s8.bf16 %v409_v11 }
  0x90   :  { %346 = vmatprep.subr.bf16.mxu0 %v235_v14  ;;  %v456_v14 = vunpack.c.l.s8.bf16 %v408_v4  ;;  %v1937_v4 = vld [vmem:[#allocation6 + $0x98] sm:$0xff] }
  0x91   :  { %v973_v5 = vunpack.c.h.s8.bf16 %v1937_v4  ;;  %v967_v56 = vunpack.c.l.s8.bf16 %v1937_v4 }
  0x92   :  { %565 = vmatprep.subr.bf16.mxu1 %v456_v14 }
  0x93   :  { %347 = vmatpush2.bf16.msra.mxu0 %v234_v16  ;;  %v450_v16 = vld [vmem:[#allocation4 + $0x158] sm:$0xff]  ;;  %566 = vmatpush1.bf16.msra.mxu1 %v455_v18 }
  0x94   :  { %348 = vmatprep.subr.bf16.mxu0 %v233_v17  ;;  %v452_v17 = vld [vmem:[#allocation4 + $0x168] sm:$0xff] }
  0x95   :  { %v542_v27 = vunpack.c.l.s8.bf16 %v452_v17 }
  0x97   :  { %349 = vmatpush2.bf16.msra.mxu0 %v232_v19  ;;  %v457_v19 = vunpack.c.l.s8.bf16 %v409_v11 }
  0x98   :  { %350 = vmatprep.subr.bf16.mxu0 %v231_v20  ;;  %v546_v20 = vunpack.c.h.s8.bf16 %v450_v16 }
  0x9a   :  { %567 = vmatprep.subr.bf16.mxu1 %v546_v20 }
  0x9b   :  { %351 = vmatpush2.bf16.msra.mxu0 %v230_v22  ;;  %v548_v22 = vunpack.c.h.s8.bf16 %v452_v17  ;;  %568 = vmatpush2.bf16.msra.mxu1 %v545_v24  ;;  %v369_v17 = vld [vmem:[%s2157_s2] sm:$0x3] }
  0x9c   :  { %352 = vmatprep.subr.bf16.mxu0 %v229_v23  ;;  %v451_v23 = vld [vmem:[#allocation4 + $0x160] sm:$0xff] }
  0x9d   :  { %v541_v31 = vunpack.c.l.s8.bf16 %v451_v23 }
  0x9f   :  { %353 = vmatpush2.bf16.msra.mxu0 %v228_v25  ;;  %v547_v25 = vunpack.c.h.s8.bf16 %v451_v23 }
  0xa0   :  { %354 = vmatprep.subr.bf16.mxu0 %v227_v26  ;;  %v540_v26 = vunpack.c.l.s8.bf16 %v450_v16  ;;  %v1946_v16 = vsub.s32 0, %v1940_v12 }
  0xa2   :  { %569 = vmatprep.subr.bf16.mxu1 %v540_v26  ;;  %v374_v24 = vrot.slane %v369_v17, %v1946_v16 }
  0xa3   :  { %355 = vmatpush2.bf16.msra.mxu0 %v226_v28  ;;  %v444_v28 = vld [vmem:[#allocation4 + $0x128] sm:$0xff] }
  0xa4   :  { %356 = vmatprep.subr.bf16.mxu0 %v225_v29  ;;  %v446_v29 = vld [vmem:[#allocation4 + $0x138] sm:$0xff]  ;;  %v534_v32 = vunpack.c.h.s8.bf16 %v444_v28  ;;  %v528_v38 = vunpack.c.l.s8.bf16 %v444_v28 }
  0xa5   :  { %v536_v34 = vunpack.c.h.s8.bf16 %v446_v29 }
  0xa7   :  { %357 = vmatpush2.bf16.msra.mxu0 %v224_v30  ;;  %v539_v30 = vunpack.c.l.s8.bf16 %v449_v21 }
  0xa8   :  { %594 = vmatprep.subr.bf16.mxu0 %v500_v39  ;;  %v530_v39 = vunpack.c.l.s8.bf16 %v446_v29 }
  0xa9   :  { %570 = vmatpush2.bf16.msra.mxu1 %v539_v30 }
  0xaa   :  { %359 = vmatmul.mubr.bf16.vlgmr.msra.gmra.mxu0 %v94_v33  ;;  %v443_v33 = vld [vmem:[#allocation4 + $0x120] sm:$0xff]  ;;  %571 = vmatprep.subr.bf16.mxu1 %v534_v32 }
  0xab   :  { %595 = vmatpush1.bf16.msra.mxu0 %v499_v42  ;;  %v533_v36 = vunpack.c.h.s8.bf16 %v443_v33  ;;  %v527_v40 = vunpack.c.l.s8.bf16 %v443_v33  ;;  %v438_v42 = vld [vmem:[#allocation4 + $0xf8] sm:$0xff] }
  0xac   :  { %596 = vmatprep.subr.bf16.mxu0 %v494_v43  ;;  %v522_v43 = vunpack.c.h.s8.bf16 %v438_v42 }
  0xad   :  { %572 = vmatpush2.bf16.msra.mxu1 %v533_v36 }
  0xae   :  { %573 = vmatprep.subr.bf16.mxu1 %v528_v38 }
  0xaf   :  { %597 = vmatpush1.bf16.msra.mxu0 %v493_v47  ;;  %v524_v47 = vunpack.c.h.s8.bf16 %v440_v45  ;;  %v429_v45 = vld [vmem:[#allocation4 + $0xb0] sm:$0xff] }
  0xb0   :  { %598 = vmatprep.subr.bf16.mxu0 %v488_v50  ;;  %v516_v50 = vunpack.c.l.s8.bf16 %v438_v42 }
  0xb1   :  { %574 = vmatpush2.bf16.msra.mxu1 %v527_v40 }
  0xb2   :  { %575 = vmatprep.subr.bf16.mxu1 %v522_v43 }
  0xb3   :  { %599 = vmatpush1.bf16.msra.mxu0 %v487_v53  ;;  %v517_v53 = vunpack.c.l.s8.bf16 %v439_v48  ;;  %v804_v48 = vld [vmem:[#allocation6 + $0x90] sm:$0xff] }
  0xb4   :  { %600 = vmatprep.subr.bf16.mxu0 %v482_v55  ;;  %v510_v55 = vunpack.c.h.s8.bf16 %v432_v54 }
  0xb5   :  { %576 = vmatpush2.bf16.msra.mxu1 %v521_v46 }
  0xb6   :  { %577 = vmatprep.subr.bf16.mxu1 %v516_v50 }
  0xb7   :  { %601 = vmatpush1.bf16.msra.mxu0 %v481_v59  ;;  %v512_v59 = vunpack.c.h.s8.bf16 %v434_v57  ;;  %v799_v57 = vld [vmem:[#allocation6 + $0x68] sm:$0xff] }
  0xb8   :  { %602 = vmatprep.subr.bf16.mxu0 %v476_v62  ;;  %v504_v62 = vunpack.c.l.s8.bf16 %v432_v54  ;;  %v972_v54 = vunpack.c.h.s8.bf16 %v804_v48  ;;  %v955_v4 = vunpack.c.l.s8.bf16 %v799_v57 }
  0xb9   :  { %578 = vmatpush2.bf16.msra.mxu1 %v515_v51  ;;  %v501_v51 = vunpack.c.h.s8.bf16 %v429_v45 }
  0xba   :  { %579 = vmatprep.subr.bf16.mxu1 %v510_v55  ;;  %v424_v55 = vld [vmem:[#allocation4 + $0x88] sm:$0xff] }
  0xbb   :  { %603 = vmatpush1.bf16.msra.mxu0 %v475_v1  ;;  %v505_v1 = vunpack.c.l.s8.bf16 %v433_v60  ;;  %v423_v60 = vld [vmem:[#allocation4 + $0x80] sm:$0xff] }
  0xbc   :  { %604 = vmatprep.subr.bf16.mxu0 %v470_v3  ;;  %v502_v3 = vunpack.c.h.s8.bf16 %v1934_v2 }
  0xbd   :  { %580 = vmatpush2.bf16.msra.mxu1 %v509_v58  ;;  %v495_v58 = vunpack.c.l.s8.bf16 %v429_v45 }
  0xbe   :  { %581 = vmatprep.subr.bf16.mxu1 %v504_v62  ;;  %v961_v62 = vunpack.c.h.s8.bf16 %v799_v57  ;;  %v817_v57 = vld [vmem:[#allocation6 + $0xf8] sm:$0xff] }
  0xbf   :  { %605 = vmatpush1.bf16.msra.mxu0 %v469_v7 }
  0xc0   :  { %606 = vmatprep.subr.bf16.mxu0 %v464_v10 }
  0xc1   :  { %582 = vmatpush2.bf16.msra.mxu1 %v503_v63  ;;  %v798_v63 = vld [vmem:[#allocation6 + $0x60] sm:$0xff] }
  0xc2   :  { %637 = vmatprep.subr.bf16.mxu1 %v502_v3  ;;  %v418_v3 = vld [vmem:[#allocation4 + $0x58] sm:$0xff]  ;;  %v954_v9 = vunpack.c.l.s8.bf16 %v798_v63 }
  0xc3   :  { %607 = vmatpush1.bf16.msra.mxu0 %v463_v13  ;;  %v1943_v13 = vsub.s32 1, %v1940_v12 }
  0xc4   :  { %608 = vmatprep.subr.bf16.mxu0 %v458_v15 }
  0xc5   :  { %v378_v21 = vrot.slane %v369_v17, %v1943_v13 }
  0xc7   :  { %609 = vmatpush1.bf16.msra.mxu0 %v457_v19 }
  0xc8   :  { %610 = vmatprep.subr.bf16.mxu0 %v548_v22 }
  0xcb   :  { %611 = vmatpush2.bf16.msra.mxu0 %v547_v25 }
  0xcc   :  { %612 = vmatprep.subr.bf16.mxu0 %v542_v27  ;;  %v385_v27 = vld [vmem:[%s2158_s3] sm:$0x3] }
  0xcd   :  { %v394_v32 = vrot.slane %v385_v27, %v1943_v13  ;;  %v390_v35 = vrot.slane %v385_v27, %v1946_v16 }
  0xcf   :  { %613 = vmatpush2.bf16.msra.mxu0 %v541_v31 }
  0xd0   :  { %614 = vmatprep.subr.bf16.mxu0 %v536_v34 }
  0xd3   :  { %615 = vmatpush2.bf16.msra.mxu0 %v535_v37 }
  0xd4   :  { %616 = vmatprep.subr.bf16.mxu0 %v530_v39 }
  0xd7   :  { %617 = vmatpush2.bf16.msra.mxu0 %v529_v41 }
  0xd8   :  { %618 = vmatprep.subr.bf16.mxu0 %v524_v47 }
  0xdb   :  { %619 = vmatpush2.bf16.msra.mxu0 %v523_v49 }
  0xdc   :  { %620 = vmatprep.subr.bf16.mxu0 %v518_v52 }
  0xdf   :  { %621 = vmatpush2.bf16.msra.mxu0 %v517_v53  ;;  %v496_v53 = vunpack.c.l.s8.bf16 %v1934_v2  ;;  %v960_v2 = vunpack.c.h.s8.bf16 %v798_v63  ;;  %v816_v63 = vld [vmem:[#allocation6 + $0xf0] sm:$0xff] }
  0xe0   :  { %622 = vmatprep.subr.bf16.mxu0 %v512_v59  ;;  %v490_v59 = vunpack.c.h.s8.bf16 %v424_v55 }
  0xe3   :  { %623 = vmatpush2.bf16.msra.mxu0 %v511_v61  ;;  %v966_v61 = vunpack.c.l.s8.bf16 %v804_v48 }
  0xe4   :  { %624 = vmatprep.subr.bf16.mxu0 %v506_v0  ;;  %v489_v0 = vunpack.c.h.s8.bf16 %v423_v60 }
  0xe7   :  { %625 = vmatpush2.bf16.msra.mxu0 %v505_v1  ;;  %v484_v1 = vunpack.c.l.s8.bf16 %v424_v55  ;;  %v442_v55 = vld [vmem:[#allocation4 + $0x118] sm:$0xff] }
  0xe8   :  { %1218 = vmatprep.subr.bf16.mxu0 %v973_v5  ;;  %v793_v5 = vld [vmem:[#allocation6 + $0x38] sm:$0xff] }
 0x12a   :  { %v274_v6 = vpop.f32.mrf.mxu0 }
 0x12b   :  { %v317_v7 = vpop.f32.mrf.mxu1 }
 0x12c   :  { %v276_v8 = vpop.f32.mrf.mxu0  ;;  %v318_v18 = vadd.f32 %v317_v7, %v274_v6  ;;  %v483_v6 = vunpack.c.l.s8.bf16 %v423_v60  ;;  %v478_v7 = vunpack.c.h.s8.bf16 %v418_v3  ;;  %v441_v60 = vld [vmem:[#allocation4 + $0x110] sm:$0xff] }
 0x12d   :  { %v319_v10 = vpop.f32.mrf.mxu1 }
 0x12e   :  { %v278_v11 = vpop.f32.mrf.mxu0  ;;  %v320_v20 = vadd.f32 %v319_v10, %v276_v8  ;;  %v417_v8 = vld [vmem:[#allocation4 + $0x50] sm:$0xff]  ;;  %v949_v10 = vunpack.c.h.s8.bf16 %v793_v5 }
 0x12f   :  { %v321_v14 = vpop.f32.mrf.mxu1 }
 0x130   :  { %v280_v15 = vpop.f32.mrf.mxu0  ;;  %v322_v26 = vadd.f32 %v321_v14, %v278_v11  ;;  %v792_v11 = vld [vmem:[#allocation6 + $0x30] sm:$0xff]  ;;  %v477_v14 = vunpack.c.h.s8.bf16 %v417_v8 }
 0x131   :  { %v323_v22 = vpop.f32.mrf.mxu1  ;;  %v948_v17 = vunpack.c.h.s8.bf16 %v792_v11 }
 0x132   :  { %v324_v30 = vadd.f32 %v323_v22, %v280_v15  ;;  %v472_v15 = vunpack.c.l.s8.bf16 %v418_v3  ;;  %v436_v3 = vld [vmem:[#allocation4 + $0xe8] sm:$0xff] }
 0x16a   :  { %v360_v19 = vpop.f32.mrf.mxu0 }
 0x16b   :  { %v361_v23 = vadd.f32 %v360_v19, %v318_v18  ;;  %v412_v18 = vld [vmem:[#allocation4 + $0x28] sm:$0xff]  ;;  %v943_v19 = vunpack.c.l.s8.bf16 %v793_v5  ;;  %v514_v5 = vunpack.c.h.s8.bf16 %v436_v3 }
 0x16c   :  { %v362_v25 = vpop.f32.mrf.mxu0  ;;  %v466_v22 = vunpack.c.h.s8.bf16 %v412_v18 }
 0x16d   :  { %v363_v28 = vadd.f32 %v362_v25, %v320_v20  ;;  %v381_v34 = vmul.f32 %v374_v24, %v361_v23  ;;  %v787_v20 = vld [vmem:[#allocation6 + $0x8] sm:$0xff]  ;;  %v411_v23 = vld [vmem:[#allocation4 + $0x20] sm:$0xff] }
 0x16e   :  { %v364_v29 = vpop.f32.mrf.mxu0  ;;  %v937_v25 = vunpack.c.h.s8.bf16 %v787_v20  ;;  %v465_v27 = vunpack.c.h.s8.bf16 %v411_v23 }
 0x16f   :  { %v382_v31 = vmul.f32 %v378_v21, %v363_v28  ;;  %v365_v33 = vadd.f32 %v364_v29, %v322_v26  ;;  %v397_v42 = vadd.f32 %v390_v35, %v381_v34  ;;  %v786_v26 = vld [vmem:[#allocation6] sm:$0xff]  ;;  %v460_v28 = vunpack.c.l.s8.bf16 %v412_v18  ;;  %v847_v18 = vld [vmem:[#allocation6 + $0x1e8] sm:$0xff] }
 0x170   :  { %v366_v36 = vpop.f32.mrf.mxu0  ;;  %v936_v29 = vunpack.c.h.s8.bf16 %v786_v26 }
 0x171   :  { %v383_v37 = vmul.f32 %v374_v24, %v365_v33  ;;  %v367_v38 = vadd.f32 %v366_v36, %v324_v30  ;;  %v398_v39 = vadd.f32 %v394_v32, %v382_v31  ;;  %v401_v49 = vmax.f32 %v397_v42, 0.0  ;;  %v454_v30 = vld [vmem:[#allocation4 + $0x178] sm:$0xff]  ;;  %v448_v42 = vld [vmem:[#allocation4 + $0x148] sm:$0xff] }
 0x172   :  { %v942_v24 = vunpack.c.l.s8.bf16 %v792_v11  ;;  %v931_v31 = vunpack.c.l.s8.bf16 %v787_v20  ;;  %v459_v33 = vunpack.c.l.s8.bf16 %v411_v23  ;;  %v550_v34 = vunpack.c.h.s8.bf16 %v454_v30  ;;  %v846_v23 = vld [vmem:[#allocation6 + $0x1e0] sm:$0xff] }
 0x173   :  { %v399_v40 = vadd.f32 %v390_v35, %v383_v37  ;;  %v384_v41 = vmul.f32 %v378_v21, %v367_v38  ;;  %v402_v46 = vmax.f32 %v398_v39, 0.0  ;;  %v471_v21 = vunpack.c.l.s8.bf16 %v417_v8  ;;  %v453_v35 = vld [vmem:[#allocation4 + $0x170] sm:$0xff] }
 0x174   :  { %v930_v36 = vunpack.c.l.s8.bf16 %v786_v26  ;;  %v828_v38 = vld [vmem:[#allocation6 + $0x150] sm:$0xff]  ;;  %v549_v39 = vunpack.c.h.s8.bf16 %v453_v35  ;;  %v543_v45 = vunpack.c.l.s8.bf16 %v453_v35  ;;  %v508_v8 = vunpack.c.l.s8.bf16 %v436_v3  ;;  %v810_v26 = vld [vmem:[#allocation6 + $0xc0] sm:$0xff]  ;;  %v1965_v35 = vld [vmem:[#allocation6 + $0x398] sm:$0xff] }
 0x175   :  { %v400_v43 = vadd.f32 %v394_v32, %v384_v41  ;;  %v403_v44 = vmax.f32 %v399_v40, 0.0  ;;  %v829_v32 = vld [vmem:[#allocation6 + $0x158] sm:$0xff]  ;;  %v544_v40 = vunpack.c.l.s8.bf16 %v454_v30  ;;  %v1020_v41 = vunpack.c.h.s8.bf16 %v828_v38  ;;  %v858_v3 = vld [vmem:[#allocation6 + $0x240] sm:$0xff] }
 0x176   :  { %v1021_v37 = vunpack.c.h.s8.bf16 %v829_v32  ;;  %v1014_v48 = vunpack.c.l.s8.bf16 %v828_v38  ;;  %v841_v30 = vld [vmem:[#allocation6 + $0x1b8] sm:$0xff] }
 0x177   :  { %v404_v47 = vmax.f32 %v400_v43, 0.0  ;;  %v1958_v52 = vpack.c.bf16 %v403_v44, %v401_v49  ;;  %v1015_v43 = vunpack.c.l.s8.bf16 %v829_v32  ;;  %v823_v44 = vld [vmem:[#allocation6 + $0x128] sm:$0xff]  ;;  %v978_v32 = vunpack.c.l.s8.bf16 %v810_v26 }
 0x178   :  { %v1009_v49 = vunpack.c.h.s8.bf16 %v823_v44  ;;  %v1039_v38 = vunpack.c.l.s8.bf16 %v841_v30 }
 0x179   :  { %v406_v50 = vpack.c.bf16 %v404_v47, %v402_v46  ;;  %v538_v46 = vunpack.c.h.s8.bf16 %v448_v42  ;;  %v447_v47 = vld [vmem:[#allocation4 + $0x140] sm:$0xff] }
 0x17b   :  { %583 = vmatprep.mubr.bf16.mxu1 %v406_v50  ;;  %626 = vmatprep.mubr.bf16.mxu0 %v406_v50 }
 0x17c   :  { %584 = vmatmul.mubr.bf16.vlgmr.msra.gmra.mxu1 %v1958_v52  ;;  %627 = vmatmul.mubr.bf16.vlgmr.msra.gmra.mxu0 %v1958_v52 }
 0x17d   :  { %638 = vmatpush1.bf16.msra.mxu1 %v501_v51  ;;  %669 = vmatprep.mubr.bf16.mxu1 %v406_v50  ;;  %v822_v50 = vld [vmem:[#allocation6 + $0x120] sm:$0xff]  ;;  %v537_v51 = vunpack.c.h.s8.bf16 %v447_v47 }
 0x17e   :  { %639 = vmatprep.subr.bf16.mxu1 %v496_v53  ;;  %1219 = vmatpush1.bf16.msra.mxu0 %v972_v54  ;;  %v532_v53 = vunpack.c.l.s8.bf16 %v448_v42  ;;  %v1008_v54 = vunpack.c.h.s8.bf16 %v822_v50  ;;  %v834_v42 = vld [vmem:[#allocation6 + $0x180] sm:$0xff] }
 0x17f   :  { %1220 = vmatprep.subr.bf16.mxu0 %v967_v56  ;;  %v1003_v56 = vunpack.c.l.s8.bf16 %v823_v44 }
 0x181   :  { %640 = vmatpush1.bf16.msra.mxu1 %v495_v58  ;;  %v531_v58 = vunpack.c.l.s8.bf16 %v447_v47 }
 0x182   :  { %641 = vmatprep.subr.bf16.mxu1 %v490_v59  ;;  %1221 = vmatpush1.bf16.msra.mxu0 %v966_v61  ;;  %v526_v59 = vunpack.c.h.s8.bf16 %v442_v55  ;;  %v1002_v61 = vunpack.c.l.s8.bf16 %v822_v50 }
 0x183   :  { %1222 = vmatprep.subr.bf16.mxu0 %v961_v62  ;;  %v997_v62 = vunpack.c.h.s8.bf16 %v817_v57 }
 0x185   :  { %642 = vmatpush1.bf16.msra.mxu1 %v489_v0  ;;  %v525_v0 = vunpack.c.h.s8.bf16 %v441_v60 }
 0x186   :  { %643 = vmatprep.subr.bf16.mxu1 %v484_v1  ;;  %1223 = vmatpush1.bf16.msra.mxu0 %v960_v2  ;;  %v520_v1 = vunpack.c.l.s8.bf16 %v442_v55  ;;  %v996_v2 = vunpack.c.h.s8.bf16 %v816_v63  ;;  %v870_v55 = vld [vmem:[#allocation6 + $0x2a0] sm:$0xff] }
 0x187   :  { %1224 = vmatprep.subr.bf16.mxu0 %v955_v4  ;;  %v519_v4 = vunpack.c.l.s8.bf16 %v441_v60 }
 0x189   :  { %644 = vmatpush1.bf16.msra.mxu1 %v483_v6  ;;  %v435_v6 = vld [vmem:[#allocation4 + $0xe0] sm:$0xff] }
 0x18a   :  { %645 = vmatprep.subr.bf16.mxu1 %v478_v7  ;;  %1225 = vmatpush1.bf16.msra.mxu0 %v954_v9  ;;  %v513_v7 = vunpack.c.h.s8.bf16 %v435_v6  ;;  %v853_v9 = vld [vmem:[#allocation6 + $0x218] sm:$0xff] }
 0x18b   :  { %1226 = vmatprep.subr.bf16.mxu0 %v949_v10  ;;  %v507_v10 = vunpack.c.l.s8.bf16 %v435_v6  ;;  %v1069_v11 = vunpack.c.h.s8.bf16 %v853_v9  ;;  %v1968_v6 = vld [vmem:[#allocation6 + $0xa8] sm:$0xff] }
 0x18d   :  { %646 = vmatpush1.bf16.msra.mxu1 %v477_v14  ;;  %v852_v14 = vld [vmem:[#allocation6 + $0x210] sm:$0xff] }
 0x18e   :  { %647 = vmatprep.subr.bf16.mxu1 %v472_v15  ;;  %1227 = vmatpush1.bf16.msra.mxu0 %v948_v17  ;;  %v1068_v15 = vunpack.c.h.s8.bf16 %v852_v14  ;;  %v1063_v17 = vunpack.c.l.s8.bf16 %v853_v9  ;;  %v1062_v20 = vunpack.c.l.s8.bf16 %v852_v14  ;;  %v1972_v9 = vsub.s32 2, %v1940_v12  ;;  %v1985_v14 = vld [vmem:[%s2161_s6] sm:$0x3f] }
 0x18f   :  { %1228 = vmatprep.subr.bf16.mxu0 %v943_v19  ;;  %v991_v19 = vunpack.c.l.s8.bf16 %v817_v57 }
 0x191   :  { %648 = vmatpush1.bf16.msra.mxu1 %v471_v21  ;;  %v990_v21 = vunpack.c.l.s8.bf16 %v816_v63 }
 0x192   :  { %649 = vmatprep.subr.bf16.mxu1 %v466_v22  ;;  %1229 = vmatpush1.bf16.msra.mxu0 %v942_v24  ;;  %v1057_v22 = vunpack.c.h.s8.bf16 %v847_v18  ;;  %v811_v24 = vld [vmem:[#allocation6 + $0xc8] sm:$0xff] }
 0x193   :  { %1230 = vmatprep.subr.bf16.mxu0 %v937_v25  ;;  %v985_v25 = vunpack.c.h.s8.bf16 %v811_v24 }
 0x195   :  { %650 = vmatpush1.bf16.msra.mxu1 %v465_v27  ;;  %v1056_v27 = vunpack.c.h.s8.bf16 %v846_v23 }
 0x196   :  { %651 = vmatprep.subr.bf16.mxu1 %v460_v28  ;;  %1231 = vmatpush1.bf16.msra.mxu0 %v936_v29  ;;  %v984_v28 = vunpack.c.h.s8.bf16 %v810_v26  ;;  %v1051_v29 = vunpack.c.l.s8.bf16 %v847_v18  ;;  %v729_v18 = vrot.slane %v1985_v14, %v1946_v16  ;;  %v733_v26 = vrot.slane %v1985_v14, %v1943_v13 }
 0x197   :  { %1232 = vmatprep.subr.bf16.mxu0 %v931_v31  ;;  %v1050_v31 = vunpack.c.l.s8.bf16 %v846_v23 }
 0x199   :  { %652 = vmatpush1.bf16.msra.mxu1 %v459_v33  ;;  %v1045_v33 = vunpack.c.h.s8.bf16 %v841_v30 }
 0x19a   :  { %653 = vmatprep.subr.bf16.mxu1 %v550_v34  ;;  %1233 = vmatpush1.bf16.msra.mxu0 %v930_v36  ;;  %v840_v34 = vld [vmem:[#allocation6 + $0x1b0] sm:$0xff]  ;;  %v1165_v36 = vunpack.c.h.s8.bf16 %v1965_v35 }
 0x19b   :  { %1234 = vmatprep.subr.bf16.mxu0 %v1021_v37  ;;  %v1044_v37 = vunpack.c.h.s8.bf16 %v840_v34 }
 0x19d   :  { %654 = vmatpush2.bf16.msra.mxu1 %v549_v39  ;;  %v835_v39 = vld [vmem:[#allocation6 + $0x188] sm:$0xff] }
 0x19e   :  { %655 = vmatprep.subr.bf16.mxu1 %v544_v40  ;;  %1235 = vmatpush2.bf16.msra.mxu0 %v1020_v41  ;;  %v1038_v40 = vunpack.c.l.s8.bf16 %v840_v34  ;;  %v1033_v41 = vunpack.c.h.s8.bf16 %v835_v39  ;;  %v1027_v44 = vunpack.c.l.s8.bf16 %v835_v39 }
 0x19f   :  { %1236 = vmatprep.subr.bf16.mxu0 %v1015_v43  ;;  %v1032_v43 = vunpack.c.h.s8.bf16 %v834_v42 }
 0x1a1   :  { %656 = vmatpush2.bf16.msra.mxu1 %v543_v45  ;;  %v877_v45 = vld [vmem:[#allocation6 + $0x2d8] sm:$0xff] }
 0x1a2   :  { %657 = vmatprep.subr.bf16.mxu1 %v538_v46  ;;  %1237 = vmatpush2.bf16.msra.mxu0 %v1014_v48  ;;  %v1026_v46 = vunpack.c.l.s8.bf16 %v834_v42  ;;  %v1117_v47 = vunpack.c.h.s8.bf16 %v877_v45  ;;  %v876_v48 = vld [vmem:[#allocation6 + $0x2d0] sm:$0xff]  ;;  %v1111_v50 = vunpack.c.l.s8.bf16 %v877_v45 }
 0x1a3   :  { %1238 = vmatprep.subr.bf16.mxu0 %v1009_v49  ;;  %v1116_v49 = vunpack.c.h.s8.bf16 %v876_v48 }
 0x1a5   :  { %658 = vmatpush2.bf16.msra.mxu1 %v537_v51  ;;  %v871_v51 = vld [vmem:[#allocation6 + $0x2a8] sm:$0xff] }
 0x1a6   :  { %659 = vmatprep.subr.bf16.mxu1 %v532_v53  ;;  %1239 = vmatpush2.bf16.msra.mxu0 %v1008_v54  ;;  %v1110_v53 = vunpack.c.l.s8.bf16 %v876_v48  ;;  %v1105_v54 = vunpack.c.h.s8.bf16 %v871_v51  ;;  %v1099_v57 = vunpack.c.l.s8.bf16 %v871_v51 }
 0x1a7   :  { %1240 = vmatprep.subr.bf16.mxu0 %v1003_v56  ;;  %v1104_v56 = vunpack.c.h.s8.bf16 %v870_v55 }
 0x1a9   :  { %660 = vmatpush2.bf16.msra.mxu1 %v531_v58  ;;  %v865_v58 = vld [vmem:[#allocation6 + $0x278] sm:$0xff] }
 0x1aa   :  { %661 = vmatprep.subr.bf16.mxu1 %v526_v59  ;;  %1241 = vmatpush2.bf16.msra.mxu0 %v1002_v61  ;;  %v1098_v59 = vunpack.c.l.s8.bf16 %v870_v55  ;;  %v1093_v60 = vunpack.c.h.s8.bf16 %v865_v58  ;;  %v864_v61 = vld [vmem:[#allocation6 + $0x270] sm:$0xff]  ;;  %v1087_v63 = vunpack.c.l.s8.bf16 %v865_v58  ;;  %v969_v58 = vunpack.c.l.s8.bf16 %v1968_v6 }
 0x1ab   :  { %1242 = vmatprep.subr.bf16.mxu0 %v997_v62  ;;  %v1092_v62 = vunpack.c.h.s8.bf16 %v864_v61 }
 0x1ad   :  { %662 = vmatpush2.bf16.msra.mxu1 %v525_v0  ;;  %v859_v0 = vld [vmem:[#allocation6 + $0x248] sm:$0xff] }
 0x1ae   :  { %663 = vmatprep.subr.bf16.mxu1 %v520_v1  ;;  %1243 = vmatpush2.bf16.msra.mxu0 %v996_v2  ;;  %v1086_v1 = vunpack.c.l.s8.bf16 %v864_v61  ;;  %v1081_v2 = vunpack.c.h.s8.bf16 %v859_v0 }
 0x1af   :  { %1244 = vmatprep.subr.bf16.mxu0 %v991_v19  ;;  %v737_v19 = vrot.slane %v1985_v14, %v1972_v9 }
 0x1b1   :  { %664 = vmatpush2.bf16.msra.mxu1 %v519_v4  ;;  %v1080_v4 = vunpack.c.h.s8.bf16 %v858_v3 }
 0x1b2   :  { %665 = vmatprep.subr.bf16.mxu1 %v514_v5  ;;  %1245 = vmatpush2.bf16.msra.mxu0 %v990_v21  ;;  %v1075_v5 = vunpack.c.l.s8.bf16 %v859_v0  ;;  %v894_v0 = vld [vmem:[#allocation6 + $0x360] sm:$0xff] }
 0x1b3   :  { %1246 = vmatprep.subr.bf16.mxu0 %v985_v25 }
 0x1b5   :  { %666 = vmatpush2.bf16.msra.mxu1 %v513_v7  ;;  %v1074_v7 = vunpack.c.l.s8.bf16 %v858_v3 }
 0x1b6   :  { %667 = vmatprep.subr.bf16.mxu1 %v508_v8  ;;  %1247 = vmatpush2.bf16.msra.mxu0 %v984_v28  ;;  %v975_v8 = vunpack.c.h.s8.bf16 %v1968_v6  ;;  %v889_v6 = vld [vmem:[#allocation6 + $0x338] sm:$0xff] }
 0x1b9   :  { %668 = vmatpush2.bf16.msra.mxu1 %v507_v10  ;;  %v1977_v10 = vld [vmem:[%s2160_s5] sm:$0x3f] }
 0x1ba   :  { %1261 = vmatprep.subr.bf16.mxu1 %v1069_v11  ;;  %v1980_v11 = vsub.s32 3, %v1940_v12 }
 0x1bc   :  { %670 = vmatmul.mubr.bf16.vlgmr.msra.gmra.mxu1 %v1958_v52  ;;  %v979_v52 = vunpack.c.l.s8.bf16 %v811_v24  ;;  %v697_v21 = vrot.slane %v1977_v10, %v1980_v11 }
 0x1bd   :  { %1262 = vmatpush1.bf16.msra.mxu1 %v1068_v15  ;;  %v685_v15 = vrot.slane %v1977_v10, %v1946_v16 }
 0x1be   :  { %1263 = vmatprep.subr.bf16.mxu1 %v1063_v17  ;;  %1248 = vmatprep.subr.bf16.mxu0 %v979_v52  ;;  %v693_v17 = vrot.slane %v1977_v10, %v1972_v9 }
 0x1bf   :  { %1249 = vmatpush2.bf16.msra.mxu0 %v978_v32 }
 0x1c0   :  { %1304 = vmatprep.subr.bf16.mxu0 %v1165_v36 }
 0x1c1   :  { %1264 = vmatpush1.bf16.msra.mxu1 %v1062_v20  ;;  %v689_v20 = vrot.slane %v1977_v10, %v1943_v13 }
 0x1c2   :  { %1265 = vmatprep.subr.bf16.mxu1 %v1057_v22 }
 0x1c5   :  { %1266 = vmatpush1.bf16.msra.mxu1 %v1056_v27  ;;  %v741_v27 = vrot.slane %v1985_v14, %v1980_v11 }
 0x1c6   :  { %1267 = vmatprep.subr.bf16.mxu1 %v1051_v29 }
 0x1c9   :  { %1268 = vmatpush1.bf16.msra.mxu1 %v1050_v31 }
 0x1ca   :  { %1269 = vmatprep.subr.bf16.mxu1 %v1045_v33 }
 0x1cd   :  { %1270 = vmatpush1.bf16.msra.mxu1 %v1044_v37 }
 0x1ce   :  { %1271 = vmatprep.subr.bf16.mxu1 %v1039_v38 }
 0x1d1   :  { %1272 = vmatpush1.bf16.msra.mxu1 %v1038_v40 }
 0x1d2   :  { %1273 = vmatprep.subr.bf16.mxu1 %v1033_v41 }
 0x1d5   :  { %1274 = vmatpush1.bf16.msra.mxu1 %v1032_v43 }
 0x1d6   :  { %1275 = vmatprep.subr.bf16.mxu1 %v1027_v44 }
 0x1d9   :  { %1276 = vmatpush1.bf16.msra.mxu1 %v1026_v46  ;;  %v900_v46 = vld [vmem:[#allocation6 + $0x390] sm:$0xff] }
 0x1da   :  { %1277 = vmatprep.subr.bf16.mxu1 %v1117_v47  ;;  %v806_v47 = vld [vmem:[#allocation6 + $0xa0] sm:$0xff]  ;;  %v1158_v61 = vunpack.c.l.s8.bf16 %v900_v46 }
 0x1dd   :  { %1278 = vmatpush2.bf16.msra.mxu1 %v1116_v49 }
 0x1de   :  { %1279 = vmatprep.subr.bf16.mxu1 %v1111_v50 }
 0x1e1   :  { %1280 = vmatpush2.bf16.msra.mxu1 %v1110_v53  ;;  %v1164_v53 = vunpack.c.h.s8.bf16 %v900_v46 }
 0x1e2   :  { %1281 = vmatprep.subr.bf16.mxu1 %v1105_v54  ;;  %v974_v54 = vunpack.c.h.s8.bf16 %v806_v47 }
 0x1e5   :  { %1282 = vmatpush2.bf16.msra.mxu1 %v1104_v56 }
 0x1e6   :  { %1283 = vmatprep.subr.bf16.mxu1 %v1099_v57  ;;  %v1159_v57 = vunpack.c.l.s8.bf16 %v1965_v35 }
 0x1e9   :  { %1284 = vmatpush2.bf16.msra.mxu1 %v1098_v59  ;;  %v895_v59 = vld [vmem:[#allocation6 + $0x368] sm:$0xff] }
 0x1ea   :  { %1285 = vmatprep.subr.bf16.mxu1 %v1093_v60  ;;  %v801_v60 = vld [vmem:[#allocation6 + $0x78] sm:$0xff]  ;;  %v1153_v35 = vunpack.c.h.s8.bf16 %v895_v59 }
 0x1ed   :  { %1286 = vmatpush2.bf16.msra.mxu1 %v1092_v62  ;;  %v968_v62 = vunpack.c.l.s8.bf16 %v806_v47 }
 0x1ee   :  { %1287 = vmatprep.subr.bf16.mxu1 %v1087_v63  ;;  %v963_v63 = vunpack.c.h.s8.bf16 %v801_v60 }
 0x1f1   :  { %1288 = vmatpush2.bf16.msra.mxu1 %v1086_v1  ;;  %v800_v1 = vld [vmem:[#allocation6 + $0x70] sm:$0xff] }
 0x1f2   :  { %1289 = vmatprep.subr.bf16.mxu1 %v1081_v2  ;;  %v1152_v2 = vunpack.c.h.s8.bf16 %v894_v0  ;;  %v962_v3 = vunpack.c.h.s8.bf16 %v800_v1 }
 0x1f5   :  { %1290 = vmatpush2.bf16.msra.mxu1 %v1080_v4  ;;  %v1147_v4 = vunpack.c.l.s8.bf16 %v895_v59 }
 0x1f6   :  { %1291 = vmatprep.subr.bf16.mxu1 %v1075_v5  ;;  %v957_v5 = vunpack.c.l.s8.bf16 %v801_v60  ;;  %v918_v60 = vld [vmem:[#allocation6 + $0x420] sm:$0xff] }
 0x1f9   :  { %1292 = vmatpush2.bf16.msra.mxu1 %v1074_v7  ;;  %v795_v7 = vld [vmem:[#allocation6 + $0x48] sm:$0xff] }
 0x1fa   :  { %1347 = vmatprep.subr.bf16.mxu1 %v975_v8  ;;  %v1146_v8 = vunpack.c.l.s8.bf16 %v894_v0 }
 0x23c   :  { %v585_v22 = vpop.f32.mrf.mxu1  ;;  %v628_v23 = vpop.f32.mrf.mxu0 }
 0x23d   :  { %v712_v24 = vmul.f32 %v685_v15, %v585_v22  ;;  %v714_v25 = vmul.f32 %v693_v17, %v628_v23  ;;  %v1135_v23 = vunpack.c.l.s8.bf16 %v889_v6 }
 0x23e   :  { %v587_v28 = vpop.f32.mrf.mxu1  ;;  %v630_v29 = vpop.f32.mrf.mxu0 }
 0x23f   :  { %v756_v30 = vadd.f32 %v729_v18, %v712_v24  ;;  %v758_v52 = vadd.f32 %v737_v19, %v714_v25  ;;  %v713_v31 = vmul.f32 %v689_v20, %v587_v28  ;;  %v715_v32 = vmul.f32 %v697_v21, %v630_v29  ;;  %v883_v25 = vld [vmem:[#allocation6 + $0x308] sm:$0xff] }
 0x240   :  { %v589_v33 = vpop.f32.mrf.mxu1  ;;  %v632_v34 = vpop.f32.mrf.mxu0  ;;  %v945_v24 = vunpack.c.l.s8.bf16 %v795_v7  ;;  %v1129_v29 = vunpack.c.h.s8.bf16 %v883_v25 }
 0x241   :  { %768 = vst [vmem:[%s2165_s10] sm:$0xff] %v756_v30  ;;  %770 = vst [vmem:[%s2165_s10 + $0x10] sm:$0xff] %v758_v52  ;;  %v757_v36 = vadd.f32 %v733_v26, %v713_v31  ;;  %v759_v37 = vadd.f32 %v741_v27, %v715_v32  ;;  %v718_v38 = vmul.f32 %v685_v15, %v589_v33  ;;  %v956_v15 = vunpack.c.l.s8.bf16 %v800_v1  ;;  %v788_v31 = vld [vmem:[#allocation6 + $0x10] sm:$0xff]  ;;  %v913_v1 = vld [vmem:[#allocation6 + $0x3f8] sm:$0xff] }
 0x242   :  { %v720_v39 = vmul.f32 %v693_v17, %v632_v34  ;;  %v591_v40 = vpop.f32.mrf.mxu1  ;;  %v634_v41 = vpop.f32.mrf.mxu0  ;;  %v1141_v17 = vunpack.c.h.s8.bf16 %v889_v6  ;;  %v938_v33 = vunpack.c.h.s8.bf16 %v788_v31  ;;  %v1123_v34 = vunpack.c.l.s8.bf16 %v883_v25 }
 0x243   :  { %769 = vst [vmem:[%s2165_s10 + $0x8] sm:$0xff] %v757_v36  ;;  %771 = vst [vmem:[%s2165_s10 + $0x18] sm:$0xff] %v759_v37  ;;  %v762_v42 = vadd.f32 %v729_v18, %v718_v38  ;;  %v719_v44 = vmul.f32 %v689_v20, %v591_v40  ;;  %v721_v45 = vmul.f32 %v697_v21, %v634_v41  ;;  %v951_v18 = vunpack.c.h.s8.bf16 %v795_v7  ;;  %v794_v20 = vld [vmem:[#allocation6 + $0x40] sm:$0xff]  ;;  %v831_v38 = vld [vmem:[#allocation6 + $0x168] sm:$0xff] }
 0x244   :  { %v764_v43 = vadd.f32 %v737_v19, %v720_v39  ;;  %v888_v19 = vld [vmem:[#allocation6 + $0x330] sm:$0xff]  ;;  %v950_v22 = vunpack.c.h.s8.bf16 %v794_v20  ;;  %v944_v28 = vunpack.c.l.s8.bf16 %v794_v20  ;;  %v932_v40 = vunpack.c.l.s8.bf16 %v788_v31 }
 0x245   :  { %774 = vst [vmem:[%s2165_s10 + $0x30] sm:$0xff] %v762_v42  ;;  %v763_v48 = vadd.f32 %v733_v26, %v719_v44  ;;  %v765_v49 = vadd.f32 %v741_v27, %v721_v45  ;;  %v2031_v55 = vpack.c.bf16 %v762_v42, %v756_v30  ;;  %v1140_v21 = vunpack.c.h.s8.bf16 %v888_v19  ;;  %v789_v26 = vld [vmem:[#allocation6 + $0x18] sm:$0xff]  ;;  %v830_v44 = vld [vmem:[#allocation6 + $0x160] sm:$0xff]  ;;  %v912_v7 = vld [vmem:[#allocation6 + $0x3f0] sm:$0xff] }
 0x246   :  { %776 = vst [vmem:[%s2165_s10 + $0x40] sm:$0xff] %v764_v43  ;;  %v2033_v56 = vpack.c.bf16 %v764_v43, %v758_v52  ;;  %v1134_v27 = vunpack.c.l.s8.bf16 %v888_v19  ;;  %v939_v30 = vunpack.c.h.s8.bf16 %v789_v26  ;;  %v882_v52 = vld [vmem:[#allocation6 + $0x300] sm:$0xff]  ;;  %v1023_v42 = vunpack.c.h.s8.bf16 %v831_v38  ;;  %v924_v43 = vld [vmem:[#allocation6 + $0x450] sm:$0xff] }
 0x247   :  { %775 = vst [vmem:[%s2165_s10 + $0x38] sm:$0xff] %v763_v48  ;;  %777 = vst [vmem:[%s2165_s10 + $0x48] sm:$0xff] %v765_v49  ;;  %v2027_v50 = vpack.c.bf16 %v763_v48, %v757_v36  ;;  %v2029_v51 = vpack.c.bf16 %v765_v49, %v759_v37  ;;  %v1128_v32 = vunpack.c.h.s8.bf16 %v882_v52  ;;  %v933_v36 = vunpack.c.l.s8.bf16 %v789_v26  ;;  %v925_v37 = vld [vmem:[#allocation6 + $0x458] sm:$0xff]  ;;  %v919_v49 = vld [vmem:[#allocation6 + $0x428] sm:$0xff] }
 0x248   :  { %v1122_v39 = vunpack.c.l.s8.bf16 %v882_v52  ;;  %v1213_v41 = vunpack.c.h.s8.bf16 %v925_v37  ;;  %v1212_v45 = vunpack.c.h.s8.bf16 %v924_v43  ;;  %v1022_v46 = vunpack.c.h.s8.bf16 %v830_v44  ;;  %v906_v52 = vld [vmem:[#allocation6 + $0x3c0] sm:$0xff]  ;;  %v812_v31 = vld [vmem:[#allocation6 + $0xd0] sm:$0xff] }
 0x249   :  { %1250 = vmatprep.mubr.bf16.mxu0 %v2027_v50  ;;  %1293 = vmatprep.mubr.bf16.mxu1 %v2029_v51  ;;  %v1207_v47 = vunpack.c.l.s8.bf16 %v925_v37  ;;  %v1017_v48 = vunpack.c.l.s8.bf16 %v831_v38  ;;  %v2046_v19 = vsub.s32 5, %v1940_v12  ;;  %v1183_v20 = vunpack.c.l.s8.bf16 %v913_v1 }
 0x24a   :  { %1251 = vmatmul.mubr.bf16.vlgmr.msra.gmra.mxu0 %v2031_v55  ;;  %1294 = vmatmul.mubr.bf16.vlgmr.msra.gmra.mxu1 %v2033_v56  ;;  %v1176_v38 = vunpack.c.h.s8.bf16 %v906_v52 }
 0x24b   :  { %1305 = vmatpush1.bf16.msra.mxu0 %v1164_v53  ;;  %1348 = vmatpush1.bf16.msra.mxu1 %v974_v54  ;;  %v825_v53 = vld [vmem:[#allocation6 + $0x138] sm:$0xff]  ;;  %v1206_v54 = vunpack.c.l.s8.bf16 %v924_v43  ;;  %v705_v26 = vrot.slane %v1977_v10, %v2046_v19 }
 0x24c   :  { %1379 = vmatprep.mubr.bf16.mxu1 %v2027_v50  ;;  %1306 = vmatprep.subr.bf16.mxu0 %v1159_v57  ;;  %v1016_v57 = vunpack.c.l.s8.bf16 %v830_v44  ;;  %v1011_v59 = vunpack.c.h.s8.bf16 %v825_v53  ;;  %v1005_v0 = vunpack.c.l.s8.bf16 %v825_v53  ;;  %v855_v44 = vld [vmem:[#allocation6 + $0x228] sm:$0xff] }
 0x24d   :  { %1349 = vmatprep.subr.bf16.mxu1 %v969_v58  ;;  %v1201_v58 = vunpack.c.h.s8.bf16 %v919_v49  ;;  %v1071_v53 = vunpack.c.h.s8.bf16 %v855_v44 }
 0x24f   :  { %1307 = vmatpush1.bf16.msra.mxu0 %v1158_v61  ;;  %1350 = vmatpush1.bf16.msra.mxu1 %v968_v62  ;;  %v824_v61 = vld [vmem:[#allocation6 + $0x130] sm:$0xff]  ;;  %v1200_v62 = vunpack.c.h.s8.bf16 %v918_v60 }
 0x250   :  { %1308 = vmatprep.subr.bf16.mxu0 %v1153_v35  ;;  %1351 = vmatprep.subr.bf16.mxu1 %v963_v63  ;;  %v1010_v35 = vunpack.c.h.s8.bf16 %v824_v61  ;;  %v1195_v63 = vunpack.c.l.s8.bf16 %v919_v49  ;;  %v980_v49 = vunpack.c.l.s8.bf16 %v812_v31 }
 0x253   :  { %1309 = vmatpush1.bf16.msra.mxu0 %v1152_v2  ;;  %1352 = vmatpush1.bf16.msra.mxu1 %v962_v3  ;;  %v819_v2 = vld [vmem:[#allocation6 + $0x108] sm:$0xff]  ;;  %v1194_v3 = vunpack.c.l.s8.bf16 %v918_v60 }
 0x254   :  { %1310 = vmatprep.subr.bf16.mxu0 %v1147_v4  ;;  %1353 = vmatprep.subr.bf16.mxu1 %v957_v5  ;;  %v1004_v4 = vunpack.c.l.s8.bf16 %v824_v61  ;;  %v1189_v5 = vunpack.c.h.s8.bf16 %v913_v1  ;;  %v999_v6 = vunpack.c.h.s8.bf16 %v819_v2  ;;  %v849_v1 = vld [vmem:[#allocation6 + $0x1f8] sm:$0xff] }
 0x257   :  { %1311 = vmatpush1.bf16.msra.mxu0 %v1146_v8  ;;  %1354 = vmatpush1.bf16.msra.mxu1 %v956_v15  ;;  %v818_v8 = vld [vmem:[#allocation6 + $0x100] sm:$0xff]  ;;  %v2043_v15 = vsub.s32 4, %v1940_v12 }
 0x258   :  { %1312 = vmatprep.subr.bf16.mxu0 %v1141_v17  ;;  %1355 = vmatprep.subr.bf16.mxu1 %v951_v18  ;;  %v1188_v17 = vunpack.c.h.s8.bf16 %v912_v7  ;;  %v998_v18 = vunpack.c.h.s8.bf16 %v818_v8  ;;  %v992_v12 = vunpack.c.l.s8.bf16 %v818_v8  ;;  %v896_v8 = vld [vmem:[#allocation6 + $0x370] sm:$0xff] }
 0x259   :  { %v745_v25 = vrot.slane %v1985_v14, %v2043_v15 }
 0x25b   :  { %1313 = vmatpush1.bf16.msra.mxu0 %v1140_v21  ;;  %1356 = vmatpush1.bf16.msra.mxu1 %v950_v22  ;;  %v993_v21 = vunpack.c.l.s8.bf16 %v819_v2  ;;  %v701_v22 = vrot.slane %v1977_v10, %v2043_v15  ;;  %v986_v10 = vunpack.c.h.s8.bf16 %v812_v31  ;;  %v897_v2 = vld [vmem:[#allocation6 + $0x378] sm:$0xff] }
 0x25c   :  { %1314 = vmatprep.subr.bf16.mxu0 %v1135_v23  ;;  %1357 = vmatprep.subr.bf16.mxu1 %v945_v24  ;;  %v907_v23 = vld [vmem:[#allocation6 + $0x3c8] sm:$0xff]  ;;  %v813_v24 = vld [vmem:[#allocation6 + $0xd8] sm:$0xff] }
 0x25f   :  { %1315 = vmatpush1.bf16.msra.mxu0 %v1134_v27  ;;  %1358 = vmatpush1.bf16.msra.mxu1 %v944_v28  ;;  %v1182_v27 = vunpack.c.l.s8.bf16 %v912_v7  ;;  %v1155_v7 = vunpack.c.h.s8.bf16 %v897_v2 }
 0x260   :  { %1316 = vmatprep.subr.bf16.mxu0 %v1129_v29  ;;  %1359 = vmatprep.subr.bf16.mxu1 %v939_v30  ;;  %v1177_v29 = vunpack.c.h.s8.bf16 %v907_v23  ;;  %v987_v30 = vunpack.c.h.s8.bf16 %v813_v24 }
 0x263   :  { %1317 = vmatpush1.bf16.msra.mxu0 %v1128_v32  ;;  %1360 = vmatpush1.bf16.msra.mxu1 %v938_v33  ;;  %v749_v33 = vrot.slane %v1985_v14, %v2046_v19  ;;  %v903_v14 = vld [vmem:[#allocation6 + $0x3a8] sm:$0xff] }
 0x264   :  { %1318 = vmatprep.subr.bf16.mxu0 %v1123_v34  ;;  %1361 = vmatprep.subr.bf16.mxu1 %v933_v36 }
 0x267   :  { %1319 = vmatpush1.bf16.msra.mxu0 %v1122_v39  ;;  %1362 = vmatpush1.bf16.msra.mxu1 %v932_v40  ;;  %v1171_v40 = vunpack.c.l.s8.bf16 %v907_v23  ;;  %v891_v23 = vld [vmem:[#allocation6 + $0x348] sm:$0xff] }
 0x268   :  { %1320 = vmatprep.subr.bf16.mxu0 %v1213_v41  ;;  %1363 = vmatprep.subr.bf16.mxu1 %v1023_v42  ;;  %v981_v41 = vunpack.c.l.s8.bf16 %v813_v24  ;;  %v1137_v31 = vunpack.c.l.s8.bf16 %v891_v23 }
 0x26b   :  { %1321 = vmatpush2.bf16.msra.mxu0 %v1212_v45  ;;  %1364 = vmatpush2.bf16.msra.mxu1 %v1022_v46 }
 0x26c   :  { %1322 = vmatprep.subr.bf16.mxu0 %v1207_v47  ;;  %1365 = vmatprep.subr.bf16.mxu1 %v1017_v48  ;;  %v1170_v48 = vunpack.c.l.s8.bf16 %v906_v52 }
 0x26f   :  { %1323 = vmatpush2.bf16.msra.mxu0 %v1206_v54  ;;  %1366 = vmatpush2.bf16.msra.mxu1 %v1016_v57  ;;  %v1167_v54 = vunpack.c.h.s8.bf16 %v903_v14  ;;  %v854_v57 = vld [vmem:[#allocation6 + $0x220] sm:$0xff] }
 0x270   :  { %1324 = vmatprep.subr.bf16.mxu0 %v1201_v58  ;;  %1367 = vmatprep.subr.bf16.mxu1 %v1011_v59  ;;  %v902_v59 = vld [vmem:[#allocation6 + $0x3a0] sm:$0xff]  ;;  %v1070_v61 = vunpack.c.h.s8.bf16 %v854_v57 }
 0x273   :  { %1325 = vmatpush2.bf16.msra.mxu0 %v1200_v62  ;;  %1368 = vmatpush2.bf16.msra.mxu1 %v1010_v35  ;;  %v1166_v35 = vunpack.c.h.s8.bf16 %v902_v59 }
 0x274   :  { %1326 = vmatprep.subr.bf16.mxu0 %v1195_v63  ;;  %1369 = vmatprep.subr.bf16.mxu1 %v1005_v0  ;;  %v1065_v63 = vunpack.c.l.s8.bf16 %v855_v44  ;;  %v1161_v0 = vunpack.c.l.s8.bf16 %v903_v14  ;;  %v879_v44 = vld [vmem:[#allocation6 + $0x2e8] sm:$0xff] }
 0x275   :  { %v927_v14 = vld [vmem:[#allocation6 + $0x468] sm:$0xff] }
 0x277   :  { %1327 = vmatpush2.bf16.msra.mxu0 %v1194_v3  ;;  %1370 = vmatpush2.bf16.msra.mxu1 %v1004_v4  ;;  %v1064_v3 = vunpack.c.l.s8.bf16 %v854_v57  ;;  %v1160_v4 = vunpack.c.l.s8.bf16 %v902_v59  ;;  %v1209_v59 = vunpack.c.l.s8.bf16 %v927_v14 }
 0x278   :  { %1328 = vmatprep.subr.bf16.mxu0 %v1189_v5  ;;  %1371 = vmatprep.subr.bf16.mxu1 %v999_v6  ;;  %v1059_v5 = vunpack.c.h.s8.bf16 %v849_v1  ;;  %v848_v6 = vld [vmem:[#allocation6 + $0x1f0] sm:$0xff] }
 0x279   :  { %v1052_v24 = vunpack.c.l.s8.bf16 %v848_v6 }
 0x27b   :  { %1329 = vmatpush2.bf16.msra.mxu0 %v1188_v17  ;;  %1372 = vmatpush2.bf16.msra.mxu1 %v998_v18  ;;  %v1058_v17 = vunpack.c.h.s8.bf16 %v848_v6  ;;  %v1154_v18 = vunpack.c.h.s8.bf16 %v896_v8 }
 0x27c   :  { %v671_v28 = vpop.f32.mrf.mxu1  ;;  %1330 = vmatprep.subr.bf16.mxu0 %v1183_v20  ;;  %1373 = vmatprep.subr.bf16.mxu1 %v993_v21  ;;  %v1053_v20 = vunpack.c.l.s8.bf16 %v849_v1  ;;  %v1149_v21 = vunpack.c.l.s8.bf16 %v897_v2  ;;  %v872_v2 = vld [vmem:[#allocation6 + $0x2b0] sm:$0xff] }
 0x27d   :  { %v716_v32 = vmul.f32 %v701_v22, %v671_v28  ;;  %v890_v28 = vld [vmem:[#allocation6 + $0x340] sm:$0xff] }
 0x27e   :  { %v673_v34 = vpop.f32.mrf.mxu1 }
 0x27f   :  { %v760_v36 = vadd.f32 %v745_v25, %v716_v32  ;;  %v717_v37 = vmul.f32 %v705_v26, %v673_v34  ;;  %1331 = vmatpush2.bf16.msra.mxu0 %v1182_v27  ;;  %1374 = vmatpush2.bf16.msra.mxu1 %v992_v12  ;;  %v842_v27 = vld [vmem:[#allocation6 + $0x1c0] sm:$0xff]  ;;  %v1143_v12 = vunpack.c.h.s8.bf16 %v891_v23  ;;  %v837_v32 = vld [vmem:[#allocation6 + $0x198] sm:$0xff] }
 0x280   :  { %v675_v39 = vpop.f32.mrf.mxu1  ;;  %1332 = vmatprep.subr.bf16.mxu0 %v1177_v29  ;;  %1375 = vmatprep.subr.bf16.mxu1 %v987_v30  ;;  %v1046_v29 = vunpack.c.h.s8.bf16 %v842_v27  ;;  %v1142_v30 = vunpack.c.h.s8.bf16 %v890_v28  ;;  %v1040_v34 = vunpack.c.l.s8.bf16 %v842_v27  ;;  %v866_v23 = vld [vmem:[#allocation6 + $0x280] sm:$0xff] }
 0x281   :  { %772 = vst [vmem:[%s2165_s10 + $0x20] sm:$0xff] %v760_v36  ;;  %v761_v42 = vadd.f32 %v749_v33, %v717_v37  ;;  %v722_v43 = vmul.f32 %v701_v22, %v675_v39  ;;  %v843_v22 = vld [vmem:[#allocation6 + $0x1c8] sm:$0xff]  ;;  %v1035_v37 = vunpack.c.h.s8.bf16 %v837_v32  ;;  %v884_v39 = vld [vmem:[#allocation6 + $0x310] sm:$0xff] }
 0x282   :  { %v677_v45 = vpop.f32.mrf.mxu1  ;;  %v1041_v52 = vunpack.c.l.s8.bf16 %v843_v22 }
 0x283   :  { %773 = vst [vmem:[%s2165_s10 + $0x28] sm:$0xff] %v761_v42  ;;  %v766_v46 = vadd.f32 %v745_v25, %v722_v43  ;;  %v723_v47 = vmul.f32 %v705_v26, %v677_v45  ;;  %1333 = vmatpush2.bf16.msra.mxu0 %v1176_v38  ;;  %1376 = vmatpush2.bf16.msra.mxu1 %v986_v10  ;;  %v1148_v25 = vunpack.c.l.s8.bf16 %v896_v8  ;;  %v1047_v26 = vunpack.c.h.s8.bf16 %v843_v22  ;;  %v836_v38 = vld [vmem:[#allocation6 + $0x190] sm:$0xff] }
 0x284   :  { %1334 = vmatprep.subr.bf16.mxu0 %v1171_v40  ;;  %1377 = vmatprep.subr.bf16.mxu1 %v981_v41  ;;  %v1034_v40 = vunpack.c.h.s8.bf16 %v836_v38  ;;  %v1130_v41 = vunpack.c.h.s8.bf16 %v884_v39  ;;  %v1028_v45 = vunpack.c.l.s8.bf16 %v836_v38 }
 0x285   :  { %778 = vst [vmem:[%s2165_s10 + $0x50] sm:$0xff] %v766_v46  ;;  %v767_v58 = vadd.f32 %v749_v33, %v723_v47  ;;  %v2070_v62 = vpack.c.bf16 %v766_v46, %v760_v36  ;;  %v885_v33 = vld [vmem:[#allocation6 + $0x318] sm:$0xff]  ;;  %v1136_v36 = vunpack.c.l.s8.bf16 %v890_v28  ;;  %v1124_v46 = vunpack.c.l.s8.bf16 %v884_v39 }
 0x286   :  { %v1131_v10 = vunpack.c.h.s8.bf16 %v885_v33  ;;  %v1125_v43 = vunpack.c.l.s8.bf16 %v885_v33  ;;  %v1119_v47 = vunpack.c.h.s8.bf16 %v879_v44  ;;  %v860_v33 = vld [vmem:[#allocation6 + $0x250] sm:$0xff] }
 0x287   :  { %779 = vst [vmem:[%s2165_s10 + $0x58] sm:$0xff] %v767_v58  ;;  %1335 = vmatpush2.bf16.msra.mxu0 %v1170_v48  ;;  %1378 = vmatpush2.bf16.msra.mxu1 %v980_v49  ;;  %v2068_v60 = vpack.c.bf16 %v767_v58, %v761_v42  ;;  %v1029_v42 = vunpack.c.l.s8.bf16 %v837_v32  ;;  %v878_v48 = vld [vmem:[#allocation6 + $0x2e0] sm:$0xff]  ;;  %v1215_v49 = vunpack.c.h.s8.bf16 %v927_v14  ;;  %v1113_v58 = vunpack.c.l.s8.bf16 %v879_v44  ;;  %v808_v14 = vld [vmem:[#allocation6 + $0xb0] sm:$0xff] }
 0x288   :  { %1390 = vmatprep.subr.bf16.mxu0 %v1071_v53  ;;  %1433 = vmatprep.subr.bf16.mxu1 %v1167_v54  ;;  %v926_v53 = vld [vmem:[#allocation6 + $0x460] sm:$0xff]  ;;  %v1118_v54 = vunpack.c.h.s8.bf16 %v878_v48 }
 0x289   :  { %1336 = vmatprep.mubr.bf16.mxu0 %v2068_v60  ;;  %v1214_v57 = vunpack.c.h.s8.bf16 %v926_v53 }
 0x28a   :  { %1337 = vmatmul.mubr.bf16.vlgmr.msra.gmra.mxu0 %v2070_v62  ;;  %1380 = vmatmul.mubr.bf16.vlgmr.msra.gmra.mxu1 %v2031_v55 }
 0x28b   :  { %1391 = vmatpush1.bf16.msra.mxu0 %v1070_v61  ;;  %1422 = vmatprep.mubr.bf16.mxu0 %v2029_v51  ;;  %v873_v61 = vld [vmem:[#allocation6 + $0x2b8] sm:$0xff] }
 0x28c   :  { %1434 = vmatpush1.bf16.msra.mxu1 %v1166_v35  ;;  %1465 = vmatprep.mubr.bf16.mxu1 %v2068_v60  ;;  %v921_v35 = vld [vmem:[#allocation6 + $0x438] sm:$0xff]  ;;  %v1107_v1 = vunpack.c.h.s8.bf16 %v873_v61 }
 0x28d   :  { %1392 = vmatprep.subr.bf16.mxu0 %v1065_v63  ;;  %1435 = vmatprep.subr.bf16.mxu1 %v1161_v0  ;;  %v1112_v63 = vunpack.c.l.s8.bf16 %v878_v48  ;;  %v1208_v0 = vunpack.c.l.s8.bf16 %v926_v53  ;;  %v1197_v8 = vunpack.c.l.s8.bf16 %v921_v35  ;;  %v803_v53 = vld [vmem:[#allocation6 + $0x88] sm:$0xff] }
 0x28f   :  { %1393 = vmatpush1.bf16.msra.mxu0 %v1064_v3  ;;  %v1203_v3 = vunpack.c.h.s8.bf16 %v921_v35  ;;  %v802_v35 = vld [vmem:[#allocation6 + $0x80] sm:$0xff] }
 0x290   :  { %1436 = vmatpush1.bf16.msra.mxu1 %v1160_v4  ;;  %1394 = vmatprep.subr.bf16.mxu0 %v1059_v5  ;;  %v920_v4 = vld [vmem:[#allocation6 + $0x430] sm:$0xff]  ;;  %v1106_v5 = vunpack.c.h.s8.bf16 %v872_v2 }
 0x291   :  { %1437 = vmatprep.subr.bf16.mxu1 %v1155_v7  ;;  %v1202_v6 = vunpack.c.h.s8.bf16 %v920_v4  ;;  %v1101_v7 = vunpack.c.l.s8.bf16 %v873_v61  ;;  %v965_v61 = vunpack.c.h.s8.bf16 %v803_v53 }
 0x293   :  { %1395 = vmatpush1.bf16.msra.mxu0 %v1058_v17  ;;  %v867_v17 = vld [vmem:[#allocation6 + $0x288] sm:$0xff] }
 0x294   :  { %1438 = vmatpush1.bf16.msra.mxu1 %v1154_v18  ;;  %1396 = vmatprep.subr.bf16.mxu0 %v1053_v20  ;;  %v915_v18 = vld [vmem:[#allocation6 + $0x408] sm:$0xff]  ;;  %v1100_v20 = vunpack.c.l.s8.bf16 %v872_v2  ;;  %v1095_v22 = vunpack.c.h.s8.bf16 %v867_v17 }
 0x295   :  { %1439 = vmatprep.subr.bf16.mxu1 %v1149_v21  ;;  %v1196_v21 = vunpack.c.l.s8.bf16 %v920_v4  ;;  %v1185_v28 = vunpack.c.l.s8.bf16 %v915_v18 }
 0x297   :  { %1397 = vmatpush1.bf16.msra.mxu0 %v1052_v24  ;;  %v1191_v24 = vunpack.c.h.s8.bf16 %v915_v18  ;;  %v844_v18 = vld [vmem:[#allocation6 + $0x1d0] sm:$0xff] }
 0x298   :  { %1440 = vmatpush1.bf16.msra.mxu1 %v1148_v25  ;;  %1398 = vmatprep.subr.bf16.mxu0 %v1047_v26  ;;  %v914_v25 = vld [vmem:[#allocation6 + $0x400] sm:$0xff]  ;;  %v1094_v26 = vunpack.c.h.s8.bf16 %v866_v23 }
 0x299   :  { %1441 = vmatprep.subr.bf16.mxu1 %v1143_v12  ;;  %v1190_v27 = vunpack.c.h.s8.bf16 %v914_v25  ;;  %v1089_v12 = vunpack.c.l.s8.bf16 %v867_v17 }
 0x29b   :  { %1399 = vmatpush1.bf16.msra.mxu0 %v1046_v29  ;;  %v861_v29 = vld [vmem:[#allocation6 + $0x258] sm:$0xff] }
 0x29c   :  { %1442 = vmatpush1.bf16.msra.mxu1 %v1142_v30  ;;  %1400 = vmatprep.subr.bf16.mxu0 %v1041_v52  ;;  %v909_v30 = vld [vmem:[#allocation6 + $0x3d8] sm:$0xff]  ;;  %v1088_v52 = vunpack.c.l.s8.bf16 %v866_v23  ;;  %v1083_v32 = vunpack.c.h.s8.bf16 %v861_v29 }
 0x29d   :  { %1443 = vmatprep.subr.bf16.mxu1 %v1137_v31  ;;  %v1184_v31 = vunpack.c.l.s8.bf16 %v914_v25  ;;  %v1173_v39 = vunpack.c.l.s8.bf16 %v909_v30  ;;  %v839_v25 = vld [vmem:[#allocation6 + $0x1a8] sm:$0xff] }
 0x29f   :  { %1401 = vmatpush1.bf16.msra.mxu0 %v1040_v34  ;;  %v1179_v34 = vunpack.c.h.s8.bf16 %v909_v30  ;;  %v838_v30 = vld [vmem:[#allocation6 + $0x1a0] sm:$0xff] }
 0x2a0   :  { %1444 = vmatpush1.bf16.msra.mxu1 %v1136_v36  ;;  %1402 = vmatprep.subr.bf16.mxu0 %v1035_v37  ;;  %v908_v36 = vld [vmem:[#allocation6 + $0x3d0] sm:$0xff]  ;;  %v1082_v37 = vunpack.c.h.s8.bf16 %v860_v33 }
 0x2a1   :  { %1445 = vmatprep.subr.bf16.mxu1 %v1131_v10  ;;  %v1178_v38 = vunpack.c.h.s8.bf16 %v908_v36  ;;  %v1077_v10 = vunpack.c.l.s8.bf16 %v861_v29  ;;  %v1037_v29 = vunpack.c.h.s8.bf16 %v839_v25 }
 0x2a3   :  { %1403 = vmatpush1.bf16.msra.mxu0 %v1034_v40  ;;  %v809_v40 = vld [vmem:[#allocation6 + $0xb8] sm:$0xff] }
 0x2a4   :  { %1446 = vmatpush1.bf16.msra.mxu1 %v1130_v41  ;;  %1404 = vmatprep.subr.bf16.mxu0 %v1029_v42  ;;  %v857_v41 = vld [vmem:[#allocation6 + $0x238] sm:$0xff]  ;;  %v1076_v42 = vunpack.c.l.s8.bf16 %v860_v33  ;;  %v977_v44 = vunpack.c.h.s8.bf16 %v809_v40  ;;  %v1031_v33 = vunpack.c.l.s8.bf16 %v839_v25  ;;  %v862_v25 = vld [vmem:[#allocation6 + $0x260] sm:$0xff] }
 0x2a5   :  { %1447 = vmatprep.subr.bf16.mxu1 %v1125_v43  ;;  %v1172_v43 = vunpack.c.l.s8.bf16 %v908_v36  ;;  %v881_v36 = vld [vmem:[#allocation6 + $0x2f8] sm:$0xff] }
 0x2a7   :  { %1405 = vmatpush1.bf16.msra.mxu0 %v1028_v45  ;;  %v1073_v45 = vunpack.c.h.s8.bf16 %v857_v41 }
 0x2a8   :  { %1448 = vmatpush1.bf16.msra.mxu1 %v1124_v46  ;;  %1406 = vmatprep.subr.bf16.mxu0 %v1119_v47  ;;  %v856_v46 = vld [vmem:[#allocation6 + $0x230] sm:$0xff]  ;;  %v976_v47 = vunpack.c.h.s8.bf16 %v808_v14 }
 0x2a9   :  { %1449 = vmatprep.subr.bf16.mxu1 %v1215_v49  ;;  %v1072_v48 = vunpack.c.h.s8.bf16 %v856_v46  ;;  %v971_v49 = vunpack.c.l.s8.bf16 %v809_v40  ;;  %v1121_v40 = vunpack.c.h.s8.bf16 %v881_v36 }
 0x2ab   :  { %1407 = vmatpush2.bf16.msra.mxu0 %v1118_v54  ;;  %v1067_v54 = vunpack.c.l.s8.bf16 %v857_v41  ;;  %v880_v41 = vld [vmem:[#allocation6 + $0x2f0] sm:$0xff] }
 0x2ac   :  { %1450 = vmatpush2.bf16.msra.mxu1 %v1214_v57  ;;  %1408 = vmatprep.subr.bf16.mxu0 %v1113_v58  ;;  %v851_v57 = vld [vmem:[#allocation6 + $0x208] sm:$0xff]  ;;  %v970_v58 = vunpack.c.l.s8.bf16 %v808_v14  ;;  %v1115_v14 = vunpack.c.l.s8.bf16 %v881_v36 }
 0x2ad   :  { %1451 = vmatprep.subr.bf16.mxu1 %v1209_v59  ;;  %v1066_v59 = vunpack.c.l.s8.bf16 %v856_v46  ;;  %v1055_v4 = vunpack.c.l.s8.bf16 %v851_v57  ;;  %v875_v46 = vld [vmem:[#allocation6 + $0x2c8] sm:$0xff] }
 0x2ae   :  { %v899_v36 = vld [vmem:[#allocation6 + $0x388] sm:$0xff] }
 0x2af   :  { %1409 = vmatpush2.bf16.msra.mxu0 %v1112_v63  ;;  %v1061_v63 = vunpack.c.h.s8.bf16 %v851_v57  ;;  %v874_v57 = vld [vmem:[#allocation6 + $0x2c0] sm:$0xff] }
 0x2b0   :  { %1452 = vmatpush2.bf16.msra.mxu1 %v1208_v0  ;;  %1410 = vmatprep.subr.bf16.mxu0 %v1107_v1  ;;  %v850_v0 = vld [vmem:[#allocation6 + $0x200] sm:$0xff]  ;;  %v964_v1 = vunpack.c.h.s8.bf16 %v802_v35 }
 0x2b1   :  { %1453 = vmatprep.subr.bf16.mxu1 %v1203_v3  ;;  %v1060_v2 = vunpack.c.h.s8.bf16 %v850_v0  ;;  %v959_v3 = vunpack.c.l.s8.bf16 %v803_v53  ;;  %v826_v53 = vld [vmem:[#allocation6 + $0x140] sm:$0xff] }
 0x2b3   :  { %1411 = vmatpush2.bf16.msra.mxu0 %v1106_v5  ;;  %v797_v5 = vld [vmem:[#allocation6 + $0x58] sm:$0xff] }
 0x2b4   :  { %1454 = vmatpush2.bf16.msra.mxu1 %v1202_v6  ;;  %1412 = vmatprep.subr.bf16.mxu0 %v1101_v7  ;;  %v958_v6 = vunpack.c.l.s8.bf16 %v802_v35  ;;  %v1054_v7 = vunpack.c.l.s8.bf16 %v850_v0  ;;  %v1103_v35 = vunpack.c.l.s8.bf16 %v875_v46  ;;  %v869_v0 = vld [vmem:[#allocation6 + $0x298] sm:$0xff] }
 0x2b5   :  { %1455 = vmatprep.subr.bf16.mxu1 %v1197_v8  ;;  %v796_v8 = vld [vmem:[#allocation6 + $0x50] sm:$0xff] }
 0x2b7   :  { %1413 = vmatpush2.bf16.msra.mxu0 %v1100_v20  ;;  %v952_v20 = vunpack.c.h.s8.bf16 %v796_v8 }
 0x2b8   :  { %1456 = vmatpush2.bf16.msra.mxu1 %v1196_v21  ;;  %1414 = vmatprep.subr.bf16.mxu0 %v1095_v22  ;;  %v1048_v21 = vunpack.c.h.s8.bf16 %v844_v18  ;;  %v947_v22 = vunpack.c.l.s8.bf16 %v797_v5 }
 0x2b9   :  { %1457 = vmatprep.subr.bf16.mxu1 %v1191_v24  ;;  %v791_v24 = vld [vmem:[#allocation6 + $0x28] sm:$0xff] }
 0x2bb   :  { %1415 = vmatpush2.bf16.msra.mxu0 %v1094_v26  ;;  %v946_v26 = vunpack.c.l.s8.bf16 %v796_v8  ;;  %v1091_v8 = vunpack.c.l.s8.bf16 %v869_v0 }
 0x2bc   :  { %1458 = vmatpush2.bf16.msra.mxu1 %v1190_v27  ;;  %1416 = vmatprep.subr.bf16.mxu0 %v1089_v12  ;;  %v1042_v27 = vunpack.c.l.s8.bf16 %v844_v18  ;;  %v941_v12 = vunpack.c.h.s8.bf16 %v791_v24  ;;  %v863_v18 = vld [vmem:[#allocation6 + $0x268] sm:$0xff] }
 0x2bd   :  { %1459 = vmatprep.subr.bf16.mxu1 %v1185_v28  ;;  %v790_v28 = vld [vmem:[#allocation6 + $0x20] sm:$0xff] }
 0x2bf   :  { %1417 = vmatpush2.bf16.msra.mxu0 %v1088_v52  ;;  %v940_v52 = vunpack.c.h.s8.bf16 %v790_v28 }
 0x2c0   :  { %1460 = vmatpush2.bf16.msra.mxu1 %v1184_v31  ;;  %1418 = vmatprep.subr.bf16.mxu0 %v1083_v32  ;;  %v1036_v31 = vunpack.c.h.s8.bf16 %v838_v30  ;;  %v935_v32 = vunpack.c.l.s8.bf16 %v791_v24  ;;  %v1085_v24 = vunpack.c.h.s8.bf16 %v863_v18 }
 0x2c1   :  { %1461 = vmatprep.subr.bf16.mxu1 %v1179_v34  ;;  %v833_v34 = vld [vmem:[#allocation6 + $0x178] sm:$0xff] }
 0x2c3   :  { %1419 = vmatpush2.bf16.msra.mxu0 %v1082_v37  ;;  %v934_v37 = vunpack.c.l.s8.bf16 %v790_v28  ;;  %v1079_v28 = vunpack.c.l.s8.bf16 %v863_v18 }
 0x2c4   :  { %1462 = vmatpush2.bf16.msra.mxu1 %v1178_v38  ;;  %1420 = vmatprep.subr.bf16.mxu0 %v1077_v10  ;;  %v1030_v38 = vunpack.c.l.s8.bf16 %v838_v30  ;;  %v1025_v10 = vunpack.c.h.s8.bf16 %v833_v34 }
 0x2c5   :  { %1463 = vmatprep.subr.bf16.mxu1 %v1173_v39  ;;  %v832_v39 = vld [vmem:[#allocation6 + $0x170] sm:$0xff] }
 0x2c7   :  { %1421 = vmatpush2.bf16.msra.mxu0 %v1076_v42  ;;  %v1024_v42 = vunpack.c.h.s8.bf16 %v832_v39 }
 0x2c8   :  { %1464 = vmatpush2.bf16.msra.mxu1 %v1172_v43  ;;  %1476 = vmatprep.subr.bf16.mxu0 %v977_v44  ;;  %v1120_v43 = vunpack.c.h.s8.bf16 %v880_v41  ;;  %v1019_v44 = vunpack.c.l.s8.bf16 %v833_v34 }
 0x2c9   :  { %1519 = vmatprep.subr.bf16.mxu1 %v1073_v45  ;;  %v827_v45 = vld [vmem:[#allocation6 + $0x148] sm:$0xff] }
 0x2ca   :  { %1423 = vmatmul.mubr.bf16.vlgmr.msra.gmra.mxu0 %v2033_v56 }
 0x2cb   :  { %1466 = vmatmul.mubr.bf16.vlgmr.msra.gmra.mxu1 %v2070_v62  ;;  %1477 = vmatpush1.bf16.msra.mxu0 %v976_v47  ;;  %v1018_v47 = vunpack.c.l.s8.bf16 %v832_v39 }
 0x2cc   :  { %1508 = vmatprep.mubr.bf16.mxu0 %v2027_v50  ;;  %1520 = vmatpush1.bf16.msra.mxu1 %v1072_v48  ;;  %v845_v50 = vld [vmem:[#allocation6 + $0x1d8] sm:$0xff]  ;;  %v1114_v48 = vunpack.c.l.s8.bf16 %v880_v41 }
 0x2cd   :  { %1551 = vmatprep.mubr.bf16.mxu1 %v2029_v51  ;;  %1478 = vmatprep.subr.bf16.mxu0 %v971_v49  ;;  %v953_v51 = vunpack.c.h.s8.bf16 %v797_v5  ;;  %v1049_v17 = vunpack.c.h.s8.bf16 %v845_v50  ;;  %v1043_v23 = vunpack.c.l.s8.bf16 %v845_v50  ;;  %v1013_v49 = vunpack.c.h.s8.bf16 %v827_v45  ;;  %v868_v50 = vld [vmem:[#allocation6 + $0x290] sm:$0xff]  ;;  %v893_v41 = vld [vmem:[#allocation6 + $0x358] sm:$0xff] }
 0x2ce   :  { %1521 = vmatprep.subr.bf16.mxu1 %v1067_v54  ;;  %v1109_v54 = vunpack.c.h.s8.bf16 %v875_v46  ;;  %v1097_v5 = vunpack.c.h.s8.bf16 %v869_v0  ;;  %v886_v46 = vld [vmem:[#allocation6 + $0x320] sm:$0xff] }
 0x2cf   :  { %1479 = vmatpush1.bf16.msra.mxu0 %v970_v58  ;;  %v1012_v58 = vunpack.c.h.s8.bf16 %v826_v53  ;;  %v922_v0 = vld [vmem:[#allocation6 + $0x440] sm:$0xff] }
 0x2d0   :  { %1522 = vmatpush1.bf16.msra.mxu1 %v1066_v59  ;;  %1480 = vmatprep.subr.bf16.mxu0 %v965_v61  ;;  %v1108_v59 = vunpack.c.h.s8.bf16 %v874_v57  ;;  %v1007_v61 = vunpack.c.l.s8.bf16 %v827_v45 }
 0x2d1   :  { %1523 = vmatprep.subr.bf16.mxu1 %v1061_v63  ;;  %v821_v63 = vld [vmem:[#allocation6 + $0x118] sm:$0xff] }
 0x2d3   :  { %1481 = vmatpush1.bf16.msra.mxu0 %v964_v1  ;;  %v1006_v1 = vunpack.c.l.s8.bf16 %v826_v53  ;;  %v1126_v53 = vunpack.c.l.s8.bf16 %v886_v46 }
 0x2d4   :  { %1524 = vmatpush1.bf16.msra.mxu1 %v1060_v2  ;;  %1482 = vmatprep.subr.bf16.mxu0 %v959_v3  ;;  %v1102_v2 = vunpack.c.l.s8.bf16 %v874_v57  ;;  %v1001_v3 = vunpack.c.h.s8.bf16 %v821_v63  ;;  %v928_v57 = vld [vmem:[#allocation6 + $0x470] sm:$0xff] }
 0x2d5   :  { %1525 = vmatprep.subr.bf16.mxu1 %v1055_v4  ;;  %v820_v4 = vld [vmem:[#allocation6 + $0x110] sm:$0xff] }
 0x2d7   :  { %1483 = vmatpush1.bf16.msra.mxu0 %v958_v6  ;;  %v1000_v6 = vunpack.c.h.s8.bf16 %v820_v4 }
 0x2d8   :  { %1526 = vmatpush1.bf16.msra.mxu1 %v1054_v7  ;;  %1484 = vmatprep.subr.bf16.mxu0 %v953_v51  ;;  %v1096_v7 = vunpack.c.h.s8.bf16 %v868_v50  ;;  %v995_v51 = vunpack.c.l.s8.bf16 %v821_v63 }
 0x2d9   :  { %1527 = vmatprep.subr.bf16.mxu1 %v1049_v17  ;;  %v815_v17 = vld [vmem:[#allocation6 + $0xe8] sm:$0xff] }
 0x2db   :  { %1485 = vmatpush1.bf16.msra.mxu0 %v952_v20  ;;  %v994_v20 = vunpack.c.l.s8.bf16 %v820_v4  ;;  %v1198_v4 = vunpack.c.l.s8.bf16 %v922_v0 }
 0x2dc   :  { %1528 = vmatpush1.bf16.msra.mxu1 %v1048_v21  ;;  %1486 = vmatprep.subr.bf16.mxu0 %v947_v22  ;;  %v1090_v21 = vunpack.c.l.s8.bf16 %v868_v50  ;;  %v989_v22 = vunpack.c.h.s8.bf16 %v815_v17  ;;  %v916_v50 = vld [vmem:[#allocation6 + $0x410] sm:$0xff] }
 0x2dd   :  { %1529 = vmatprep.subr.bf16.mxu1 %v1043_v23  ;;  %v814_v23 = vld [vmem:[#allocation6 + $0xe0] sm:$0xff] }
 0x2de   :  { %v982_v30 = vunpack.c.l.s8.bf16 %v814_v23 }
 0x2df   :  { %1487 = vmatpush1.bf16.msra.mxu0 %v946_v26  ;;  %v988_v26 = vunpack.c.h.s8.bf16 %v814_v23 }
 0x2e0   :  { %1530 = vmatpush1.bf16.msra.mxu1 %v1042_v27  ;;  %1488 = vmatprep.subr.bf16.mxu0 %v941_v12  ;;  %v1084_v27 = vunpack.c.h.s8.bf16 %v862_v25  ;;  %v983_v12 = vunpack.c.l.s8.bf16 %v815_v17 }
 0x2e1   :  { %1531 = vmatprep.subr.bf16.mxu1 %v1037_v29  ;;  %v905_v29 = vld [vmem:[#allocation6 + $0x3b8] sm:$0xff] }
 0x2e2   :  { %v1163_v34 = vunpack.c.l.s8.bf16 %v905_v29 }
 0x2e3   :  { %1489 = vmatpush1.bf16.msra.mxu0 %v940_v52  ;;  %v1078_v52 = vunpack.c.l.s8.bf16 %v862_v25 }
 0x2e4   :  { %1532 = vmatpush1.bf16.msra.mxu1 %v1036_v31  ;;  %1490 = vmatprep.subr.bf16.mxu0 %v935_v32  ;;  %v1169_v31 = vunpack.c.h.s8.bf16 %v905_v29  ;;  %v904_v32 = vld [vmem:[#allocation6 + $0x3b0] sm:$0xff] }
 0x2e5   :  { %1533 = vmatprep.subr.bf16.mxu1 %v1031_v33  ;;  %v1168_v33 = vunpack.c.h.s8.bf16 %v904_v32 }
 0x2e7   :  { %1491 = vmatpush1.bf16.msra.mxu0 %v934_v37  ;;  %v1162_v37 = vunpack.c.l.s8.bf16 %v904_v32 }
 0x2e8   :  { %1534 = vmatpush1.bf16.msra.mxu1 %v1030_v38  ;;  %1492 = vmatprep.subr.bf16.mxu0 %v1025_v10  ;;  %v1157_v38 = vunpack.c.h.s8.bf16 %v899_v36  ;;  %v898_v10 = vld [vmem:[#allocation6 + $0x380] sm:$0xff] }
 0x2e9   :  { %1535 = vmatprep.subr.bf16.mxu1 %v1121_v40  ;;  %v1156_v39 = vunpack.c.h.s8.bf16 %v898_v10  ;;  %v1151_v40 = vunpack.c.l.s8.bf16 %v899_v36 }
 0x2eb   :  { %1493 = vmatpush2.bf16.msra.mxu0 %v1024_v42  ;;  %v1150_v42 = vunpack.c.l.s8.bf16 %v898_v10 }
 0x2ec   :  { %1536 = vmatpush2.bf16.msra.mxu1 %v1120_v43  ;;  %1494 = vmatprep.subr.bf16.mxu0 %v1019_v44  ;;  %v1145_v43 = vunpack.c.h.s8.bf16 %v893_v41  ;;  %v892_v44 = vld [vmem:[#allocation6 + $0x350] sm:$0xff] }
 0x2ed   :  { %1537 = vmatprep.subr.bf16.mxu1 %v1115_v14  ;;  %v887_v14 = vld [vmem:[#allocation6 + $0x328] sm:$0xff] }
 0x2ee   :  { %v1133_v45 = vunpack.c.h.s8.bf16 %v887_v14 }
 0x2ef   :  { %1495 = vmatpush2.bf16.msra.mxu0 %v1018_v47  ;;  %v1132_v47 = vunpack.c.h.s8.bf16 %v886_v46 }
 0x2f0   :  { %1538 = vmatpush2.bf16.msra.mxu1 %v1114_v48  ;;  %1496 = vmatprep.subr.bf16.mxu0 %v1013_v49  ;;  %v1127_v48 = vunpack.c.l.s8.bf16 %v887_v14  ;;  %v929_v49 = vld [vmem:[#allocation6 + $0x478] sm:$0xff] }
 0x2f1   :  { %1539 = vmatprep.subr.bf16.mxu1 %v1109_v54  ;;  %v1217_v54 = vunpack.c.h.s8.bf16 %v929_v49 }
 0x2f3   :  { %1497 = vmatpush2.bf16.msra.mxu0 %v1012_v58  ;;  %v1216_v58 = vunpack.c.h.s8.bf16 %v928_v57 }
 0x2f4   :  { %1540 = vmatpush2.bf16.msra.mxu1 %v1108_v59  ;;  %1498 = vmatprep.subr.bf16.mxu0 %v1007_v61  ;;  %v1211_v59 = vunpack.c.l.s8.bf16 %v929_v49  ;;  %v923_v61 = vld [vmem:[#allocation6 + $0x448] sm:$0xff] }
 0x2f5   :  { %1541 = vmatprep.subr.bf16.mxu1 %v1103_v35  ;;  %v1210_v35 = vunpack.c.l.s8.bf16 %v928_v57  ;;  %v1205_v63 = vunpack.c.h.s8.bf16 %v923_v61 }
 0x2f7   :  { %1499 = vmatpush2.bf16.msra.mxu0 %v1006_v1  ;;  %v1204_v1 = vunpack.c.h.s8.bf16 %v922_v0 }
 0x2f8   :  { %1542 = vmatpush2.bf16.msra.mxu1 %v1102_v2  ;;  %1500 = vmatprep.subr.bf16.mxu0 %v1001_v3  ;;  %v1199_v2 = vunpack.c.l.s8.bf16 %v923_v61  ;;  %v917_v3 = vld [vmem:[#allocation6 + $0x418] sm:$0xff] }
 0x2f9   :  { %1543 = vmatprep.subr.bf16.mxu1 %v1097_v5  ;;  %v1193_v5 = vunpack.c.h.s8.bf16 %v917_v3 }
 0x2fb   :  { %1501 = vmatpush2.bf16.msra.mxu0 %v1000_v6  ;;  %v1192_v6 = vunpack.c.h.s8.bf16 %v916_v50 }
 0x2fc   :  { %1544 = vmatpush2.bf16.msra.mxu1 %v1096_v7  ;;  %1502 = vmatprep.subr.bf16.mxu0 %v995_v51  ;;  %v1187_v7 = vunpack.c.l.s8.bf16 %v917_v3  ;;  %v911_v51 = vld [vmem:[#allocation6 + $0x3e8] sm:$0xff] }
 0x2fd   :  { %1545 = vmatprep.subr.bf16.mxu1 %v1091_v8  ;;  %v1186_v8 = vunpack.c.l.s8.bf16 %v916_v50  ;;  %v1181_v18 = vunpack.c.h.s8.bf16 %v911_v51 }
 0x2ff   :  { %1503 = vmatpush2.bf16.msra.mxu0 %v994_v20  ;;  %v910_v20 = vld [vmem:[#allocation6 + $0x3e0] sm:$0xff] }
 0x300   :  { %1546 = vmatpush2.bf16.msra.mxu1 %v1090_v21  ;;  %1504 = vmatprep.subr.bf16.mxu0 %v989_v22  ;;  %v1180_v21 = vunpack.c.h.s8.bf16 %v910_v20  ;;  %v1174_v25 = vunpack.c.l.s8.bf16 %v910_v20 }
 0x301   :  { %1547 = vmatprep.subr.bf16.mxu1 %v1085_v24  ;;  %v1175_v24 = vunpack.c.l.s8.bf16 %v911_v51 }
 0x303   :  { %1505 = vmatpush2.bf16.msra.mxu0 %v988_v26 }
 0x304   :  { %1548 = vmatpush2.bf16.msra.mxu1 %v1084_v27  ;;  %1506 = vmatprep.subr.bf16.mxu0 %v983_v12  ;;  %v2087_v12 = vld [vmem:[%s2163_s8] sm:$0x3f] }
 0x305   :  { %1549 = vmatprep.subr.bf16.mxu1 %v1079_v28 }
 0x307   :  { %1507 = vmatpush2.bf16.msra.mxu0 %v982_v30  ;;  %v2092_v30 = vld [vmem:[%s2164_s9] sm:$0x3f] }
 0x308   :  { %1550 = vmatpush2.bf16.msra.mxu1 %v1078_v52  ;;  %1562 = vmatprep.subr.bf16.mxu0 %v1169_v31  ;;  %v1610_v31 = vrot.slane %v2087_v12, %v1946_v16  ;;  %v1654_v36 = vrot.slane %v2092_v30, %v1946_v16 }
 0x30a   :  { %1509 = vmatmul.mubr.bf16.vlgmr.msra.gmra.mxu0 %v2031_v55  ;;  %v1144_v55 = vunpack.c.h.s8.bf16 %v892_v44  ;;  %v1252_v17 = vpop.f32.mrf.mxu0  ;;  %v1295_v22 = vpop.f32.mrf.mxu1 }
 0x30b   :  { %1552 = vmatmul.mubr.bf16.vlgmr.msra.gmra.mxu1 %v2033_v56  ;;  %1563 = vmatpush1.bf16.msra.mxu0 %v1168_v33  ;;  %v1139_v56 = vunpack.c.l.s8.bf16 %v893_v41  ;;  %v1296_v52 = vadd.f32 %v1295_v22, %v1252_v17  ;;  %v1666_v17 = vrot.slane %v2092_v30, %v1980_v11 }
 0x30c   :  { %1594 = vmatprep.mubr.bf16.mxu0 %v2068_v60  ;;  %1564 = vmatprep.subr.bf16.mxu0 %v1163_v34  ;;  %v1138_v60 = vunpack.c.l.s8.bf16 %v892_v44  ;;  %v1254_v23 = vpop.f32.mrf.mxu0  ;;  %v1297_v26 = vpop.f32.mrf.mxu1 }
 0x30d   :  { %v1298_v33 = vadd.f32 %v1297_v26, %v1254_v23 }
 0x30e   :  { %v1256_v27 = vpop.f32.mrf.mxu0  ;;  %v1299_v28 = vpop.f32.mrf.mxu1 }
 0x30f   :  { %1565 = vmatpush1.bf16.msra.mxu0 %v1162_v37  ;;  %v1614_v37 = vrot.slane %v2087_v12, %v1943_v13 }
 0x310   :  { %1566 = vmatprep.subr.bf16.mxu0 %v1157_v38  ;;  %v1258_v29 = vpop.f32.mrf.mxu0  ;;  %v1301_v38 = vpop.f32.mrf.mxu1 }
 0x311   :  { %v1302_v44 = vadd.f32 %v1301_v38, %v1258_v29 }
 0x313   :  { %1567 = vmatpush1.bf16.msra.mxu0 %v1156_v39  ;;  %v1300_v39 = vadd.f32 %v1299_v28, %v1256_v27 }
 0x314   :  { %1568 = vmatprep.subr.bf16.mxu0 %v1151_v40 }
 0x317   :  { %1569 = vmatpush1.bf16.msra.mxu0 %v1150_v42  ;;  %v1658_v42 = vrot.slane %v2092_v30, %v1943_v13 }
 0x318   :  { %1570 = vmatprep.subr.bf16.mxu0 %v1145_v43 }
 0x31b   :  { %1571 = vmatpush1.bf16.msra.mxu0 %v1144_v55 }
 0x31c   :  { %1572 = vmatprep.subr.bf16.mxu0 %v1139_v56 }
 0x31f   :  { %1573 = vmatpush1.bf16.msra.mxu0 %v1138_v60 }
 0x320   :  { %1574 = vmatprep.subr.bf16.mxu0 %v1133_v45 }
 0x323   :  { %1575 = vmatpush1.bf16.msra.mxu0 %v1132_v47 }
 0x324   :  { %1576 = vmatprep.subr.bf16.mxu0 %v1127_v48 }
 0x327   :  { %1577 = vmatpush1.bf16.msra.mxu0 %v1126_v53 }
 0x328   :  { %1578 = vmatprep.subr.bf16.mxu0 %v1217_v54 }
 0x32b   :  { %1579 = vmatpush2.bf16.msra.mxu0 %v1216_v58 }
 0x32c   :  { %1580 = vmatprep.subr.bf16.mxu0 %v1211_v59 }
 0x32f   :  { %1581 = vmatpush2.bf16.msra.mxu0 %v1210_v35 }
 0x330   :  { %1582 = vmatprep.subr.bf16.mxu0 %v1205_v63 }
 0x333   :  { %1583 = vmatpush2.bf16.msra.mxu0 %v1204_v1  ;;  %v1618_v1 = vrot.slane %v2087_v12, %v1972_v9 }
 0x334   :  { %1584 = vmatprep.subr.bf16.mxu0 %v1199_v2 }
 0x337   :  { %1585 = vmatpush2.bf16.msra.mxu0 %v1198_v4  ;;  %v1662_v4 = vrot.slane %v2092_v30, %v1972_v9 }
 0x338   :  { %1586 = vmatprep.subr.bf16.mxu0 %v1193_v5 }
 0x33b   :  { %1587 = vmatpush2.bf16.msra.mxu0 %v1192_v6  ;;  %v1622_v6 = vrot.slane %v2087_v12, %v1980_v11 }
 0x33c   :  { %1588 = vmatprep.subr.bf16.mxu0 %v1187_v7 }
 0x33f   :  { %1589 = vmatpush2.bf16.msra.mxu0 %v1186_v8 }
 0x340   :  { %1590 = vmatprep.subr.bf16.mxu0 %v1181_v18 }
 0x343   :  { %1591 = vmatpush2.bf16.msra.mxu0 %v1180_v21 }
 0x344   :  { %1592 = vmatprep.subr.bf16.mxu0 %v1175_v24 }
 0x347   :  { %1593 = vmatpush2.bf16.msra.mxu0 %v1174_v25 }
 0x34a   :  { %v1338_v32 = vpop.f32.mrf.mxu0  ;;  %1595 = vmatmul.mubr.bf16.vlgmr.msra.gmra.mxu0 %v2070_v62  ;;  %v1381_v57 = vpop.f32.mrf.mxu1 }
 0x34b   :  { %v1339_v34 = vadd.f32 %v1338_v32, %v1296_v52 }
 0x34c   :  { %v1340_v10 = vpop.f32.mrf.mxu0  ;;  %v1383_v58 = vpop.f32.mrf.mxu1 }
 0x34d   :  { %v1637_v40 = vmul.f32 %v1610_v31, %v1339_v34  ;;  %v1341_v41 = vadd.f32 %v1340_v10, %v1298_v33 }
 0x34e   :  { %v1342_v43 = vpop.f32.mrf.mxu0  ;;  %v1385_v59 = vpop.f32.mrf.mxu1 }
 0x34f   :  { %v1681_v55 = vadd.f32 %v1654_v36, %v1637_v40  ;;  %v1638_v62 = vmul.f32 %v1614_v37, %v1341_v41  ;;  %v1343_v56 = vadd.f32 %v1342_v43, %v1300_v39  ;;  %v1626_v43 = vrot.slane %v2087_v12, %v2043_v15 }
 0x350   :  { %v1344_v14 = vpop.f32.mrf.mxu0  ;;  %v1387_v61 = vpop.f32.mrf.mxu1 }
 0x351   :  { %1734 = vtanh.f32 %v1681_v55  ;;  %v1682_v60 = vadd.f32 %v1658_v42, %v1638_v62  ;;  %v1643_v16 = vmul.f32 %v1610_v31, %v1343_v56  ;;  %v1345_v45 = vadd.f32 %v1344_v14, %v1302_v44 }
 0x352   :  { %v1670_v56 = vrot.slane %v2092_v30, %v2043_v15  ;;  %v1630_v14 = vrot.slane %v2087_v12, %v2046_v19 }
 0x353   :  { %1736 = vtanh.f32 %v1682_v60  ;;  %v1687_v46 = vadd.f32 %v1654_v36, %v1643_v16  ;;  %v1644_v47 = vmul.f32 %v1614_v37, %v1345_v45 }
 0x355   :  { %1738 = vtanh.f32 %v1687_v46  ;;  %v1688_v48 = vadd.f32 %v1658_v42, %v1644_v47 }
 0x357   :  { %1740 = vtanh.f32 %v1688_v48  ;;  %v1674_v48 = vrot.slane %v2092_v30, %v2046_v19 }
 0x35e   :  { %v1735_v49 = vpop.eup %1734 }
 0x35f   :  { %1705 = vst [vmem:[%s2166_s11] sm:$0xff] %v1735_v49 }
 0x360   :  { %v1737_v13 = vpop.eup %1736 }
 0x361   :  { %1706 = vst [vmem:[%s2166_s11 + $0x8] sm:$0xff] %v1737_v13 }
 0x362   :  { %v1739_v53 = vpop.eup %1738 }
 0x363   :  { %1711 = vst [vmem:[%s2166_s11 + $0x30] sm:$0xff] %v1739_v53 }
 0x364   :  { %v1741_v54 = vpop.eup %1740 }
 0x365   :  { %1712 = vst [vmem:[%s2166_s11 + $0x38] sm:$0xff] %v1741_v54 }
 0x38a   :  { %v1424_v35 = vpop.f32.mrf.mxu0 }
 0x38b   :  { %v1425_v63 = vadd.f32 %v1424_v35, %v1381_v57  ;;  %v1467_v0 = vpop.f32.mrf.mxu1 }
 0x38c   :  { %v1426_v2 = vpop.f32.mrf.mxu0 }
 0x38d   :  { %v1468_v3 = vadd.f32 %v1467_v0, %v1425_v63  ;;  %v1427_v5 = vadd.f32 %v1426_v2, %v1383_v58  ;;  %v1469_v50 = vpop.f32.mrf.mxu1 }
 0x38e   :  { %v1428_v7 = vpop.f32.mrf.mxu0 }
 0x38f   :  { %v1639_v51 = vmul.f32 %v1618_v1, %v1468_v3  ;;  %v1470_v8 = vadd.f32 %v1469_v50, %v1427_v5  ;;  %v1429_v18 = vadd.f32 %v1428_v7, %v1385_v59  ;;  %v1471_v20 = vpop.f32.mrf.mxu1 }
 0x390   :  { %v1430_v21 = vpop.f32.mrf.mxu0 }
 0x391   :  { %v1683_v22 = vadd.f32 %v1662_v4, %v1639_v51  ;;  %v1640_v23 = vmul.f32 %v1622_v6, %v1470_v8  ;;  %v1472_v24 = vadd.f32 %v1471_v20, %v1429_v18  ;;  %v1431_v25 = vadd.f32 %v1430_v21, %v1387_v61  ;;  %v1473_v26 = vpop.f32.mrf.mxu1 }
 0x393   :  { %1742 = vtanh.f32 %v1683_v22  ;;  %v1684_v9 = vadd.f32 %v1666_v17, %v1640_v23  ;;  %v1645_v27 = vmul.f32 %v1618_v1, %v1472_v24  ;;  %v1474_v28 = vadd.f32 %v1473_v26, %v1431_v25 }
 0x395   :  { %1744 = vtanh.f32 %v1684_v9  ;;  %v1689_v29 = vadd.f32 %v1662_v4, %v1645_v27  ;;  %v1646_v52 = vmul.f32 %v1622_v6, %v1474_v28 }
 0x397   :  { %1746 = vtanh.f32 %v1689_v29  ;;  %v1690_v31 = vadd.f32 %v1666_v17, %v1646_v52 }
 0x399   :  { %1748 = vtanh.f32 %v1690_v31 }
 0x3a0   :  { %v1743_v32 = vpop.eup %1742 }
 0x3a1   :  { %1707 = vst [vmem:[%s2166_s11 + $0x10] sm:$0xff] %v1743_v32 }
 0x3a2   :  { %v1745_v11 = vpop.eup %1744 }
 0x3a3   :  { %1708 = vst [vmem:[%s2166_s11 + $0x18] sm:$0xff] %v1745_v11 }
 0x3a4   :  { %v1747_v33 = vpop.eup %1746 }
 0x3a5   :  { %1713 = vst [vmem:[%s2166_s11 + $0x40] sm:$0xff] %v1747_v33 }
 0x3a6   :  { %v1749_v34 = vpop.eup %1748 }
 0x3a7   :  { %1714 = vst [vmem:[%s2166_s11 + $0x48] sm:$0xff] %v1749_v34 }
 0x3ca   :  { %v1510_v36 = vpop.f32.mrf.mxu0 }
 0x3cb   :  { %v1553_v37 = vpop.f32.mrf.mxu1 }
 0x3cc   :  { %v1512_v38 = vpop.f32.mrf.mxu0  ;;  %v1554_v42 = vadd.f32 %v1553_v37, %v1510_v36 }
 0x3cd   :  { %v1555_v10 = vpop.f32.mrf.mxu1 }
 0x3ce   :  { %v1514_v39 = vpop.f32.mrf.mxu0  ;;  %v1556_v55 = vadd.f32 %v1555_v10, %v1512_v38 }
 0x3cf   :  { %v1557_v40 = vpop.f32.mrf.mxu1 }
 0x3d0   :  { %v1516_v41 = vpop.f32.mrf.mxu0  ;;  %v1558_v45 = vadd.f32 %v1557_v40, %v1514_v39 }
 0x3d1   :  { %v1559_v60 = vpop.f32.mrf.mxu1 }
 0x3d2   :  { %v1560_v13 = vadd.f32 %v1559_v60, %v1516_v41 }
 0x40a   :  { %v1596_v44 = vpop.f32.mrf.mxu0 }
 0x40b   :  { %v1597_v62 = vadd.f32 %v1596_v44, %v1554_v42 }
 0x40c   :  { %v1598_v16 = vpop.f32.mrf.mxu0 }
 0x40d   :  { %v1641_v46 = vmul.f32 %v1626_v43, %v1597_v62  ;;  %v1599_v47 = vadd.f32 %v1598_v16, %v1556_v55 }
 0x40e   :  { %v1600_v49 = vpop.f32.mrf.mxu0 }
 0x40f   :  { %v1685_v53 = vadd.f32 %v1670_v56, %v1641_v46  ;;  %v1642_v54 = vmul.f32 %v1630_v14, %v1599_v47  ;;  %v1601_v57 = vadd.f32 %v1600_v49, %v1558_v45 }
 0x410   :  { %v1602_v58 = vpop.f32.mrf.mxu0 }
 0x411   :  { %1750 = vtanh.f32 %v1685_v53  ;;  %v1686_v59 = vadd.f32 %v1674_v48, %v1642_v54  ;;  %v1647_v15 = vmul.f32 %v1626_v43, %v1601_v57  ;;  %v1603_v61 = vadd.f32 %v1602_v58, %v1560_v13 }
 0x413   :  { %1752 = vtanh.f32 %v1686_v59  ;;  %v1691_v12 = vadd.f32 %v1670_v56, %v1647_v15  ;;  %v1648_v35 = vmul.f32 %v1630_v14, %v1603_v61 }
 0x415   :  { %1754 = vtanh.f32 %v1691_v12  ;;  %v1692_v63 = vadd.f32 %v1674_v48, %v1648_v35 }
 0x417   :  { %1756 = vtanh.f32 %v1692_v63 }
 0x41e   :  { %v1751_v0 = vpop.eup %1750 }
 0x41f   :  { %1709 = vst [vmem:[%s2166_s11 + $0x20] sm:$0xff] %v1751_v0 }
 0x420   :  { %v1753_v19 = vpop.eup %1752 }
 0x421   :  { %1710 = vst [vmem:[%s2166_s11 + $0x28] sm:$0xff] %v1753_v19 }
 0x422   :  { %v1755_v30 = vpop.eup %1754 }
 0x423   :  { %1715 = vst [vmem:[%s2166_s11 + $0x50] sm:$0xff] %v1755_v30 }
 0x424   :  { %v1757_v1 = vpop.eup %1756 }
 0x425   :  { %1716 = vst [vmem:[%s2166_s11 + $0x58] sm:$0xff] %v1757_v1 }
 0x426   :  { %1725 = vsyncpa [#allocation3], 1 }
 0x427   :  { %1726 = vsyncpa [#allocation5], 1 }

</bundles_post_ra>
